<compile_context>
chip_gen: v7x
topology: tpu7x:2x2x1
jax: 0.10.0
libtpu: 0.0.40
codegen_flags: <defaults>
</compile_context>

<pallas_src>
import jax
import jax.numpy as jnp
from jax.experimental import pallas as pl
from jax.experimental.pallas import tpu as pltpu

# ----------------------------- configuration -----------------------------
B, S, C_CHAR = 2, 8, 12            # batch, sequence length, chars per token
WORD_VOCAB, CHAR_VOCAB = 50, 30
D_WORD, D_CHAR = 32, 16
K = 3                              # char conv kernel width ("same" padding)
F_CNN = 32                         # char CNN output filters
D_IN = D_WORD + F_CNN              # RNN input dim (USE_CASE=False -> no feature embeds)
H = 32                             # RNN hidden
N_TAGS = 8
N_TASKS = 2
CONCAT_FLAG = True
D_FEAT = 2 * H if CONCAT_FLAG else H

B_PAD = 8                          # pad batch to the sublane tile (8) -> aligned timestep slices
N_PAD = B_PAD * S                  # padded tokens per call (time-major row = t*B_PAD + b)


# ----------------------------- fused Pallas kernel -----------------------------
def fused_tagger_kernel(word_ref, charp_ref, mask_ref, lab_ref,
                        cnn_w_ref, cnn_b_ref,
                        wxw_ref, wxc_ref, wh_ref, rb_ref,
                        tw_ref, tb_ref,
                        cwt_ref, cwh_ref, cb_ref,
                        loss_ref, packed_ref, hf_sc):
    """Inputs (all VMEM, whole-array blocks):
         word_ref : (N_PAD, D_WORD)          bf16, time-major flattened word embeddings
         charp_ref: (C+K-1, N_PAD, D_CHAR)   bf16, padded char embeddings, position major
         mask_ref : (N_PAD, 1) f32           token mask (0 for padded timesteps AND pad batch rows)
         lab_ref  : (N_PAD, 1) i32           gold tag ids
         cnn_w_ref: (K*D_CHAR, F_CNN) bf16,  cnn_b_ref: (1, F_CNN) f32
         wxw_ref  : (D_WORD, H) bf16, wxc_ref: (F_CNN, H) bf16, wh_ref: (H, H) bf16, rb_ref: (1, H) f32
         tw_ref   : (H, H) bf16, tb_ref: (1, H) f32
         cwt_ref  : (H, N_TAGS) bf16, cwh_ref: (H, N_TAGS) bf16, cb_ref: (1, N_TAGS) f32
       Outputs:
         loss_ref  : (1, 1) f32 SMEM scalar
         packed_ref: (N_PAD, 2H) f32, [:, :H] = task head, [:, H:] = shared RNN out (masked)
       Scratch:
         hf_sc     : (N_PAD, H) f32 VMEM, per-timestep masked hidden states
    """
    # ---- char CNN: single fused matmul over the 3-tap window operand, bias + ReLU, max-pool
    cp = charp_ref[...]                                               # (C+K-1, N_PAD, Dc)
    taps = [cp[r:r + C_CHAR].reshape(C_CHAR * N_PAD, D_CHAR) for r in range(K)]
    win = jnp.concatenate(taps, axis=-1)                              # (C*N_PAD, K*Dc)
    z = jnp.dot(win, cnn_w_ref[...], preferred_element_type=jnp.float32) + cnn_b_ref[...]
    z = jnp.maximum(z, 0.0)                                           # conv + ReLU
    char_feat = jnp.max(z.reshape(C_CHAR, N_PAD, F_CNN), axis=0)      # max-pool -> (N_PAD, F)

    # ---- RNN input projection: split-weight matmuls (no lane concat on critical path)
    xproj = (jnp.dot(word_ref[...], wxw_ref[...], preferred_element_type=jnp.float32)
             + jnp.dot(char_feat.astype(jnp.bfloat16), wxc_ref[...],
                       preferred_element_type=jnp.float32)
             + rb_ref[...])                                           # (N_PAD, H) f32

    # ---- shared masked RNN: fully static unrolled time loop, aligned (8, H) slices
    wh = wh_ref[...]                                                  # (H, H) bf16, hoisted
    mask_all = mask_ref[...]                                          # (N_PAD, 1) f32
    inv_mask_all = 1.0 - mask_all                                     # hoisted out of loop

    h = jnp.zeros((B_PAD, H), jnp.float32)
    for t in range(S):                                                # S = 8, static unroll
        lo = t * B_PAD                                                # multiple of 8 -> aligned
        x_t = xproj[lo:lo + B_PAD, :]                                 # (8, H)
        m_t = mask_all[lo:lo + B_PAD, :]                              # (8, 1)
        im_t = inv_mask_all[lo:lo + B_PAD, :]
        h_new = jnp.tanh(x_t + jnp.dot(h.astype(jnp.bfloat16), wh,
                                       preferred_element_type=jnp.float32))
        h = m_t * h_new + im_t * h                                    # carry state across padding
        hf_sc[lo:lo + B_PAD, :] = m_t * h                             # direct per-step store

    hf_all = hf_sc[...]                                               # (N_PAD, H), read once

    # ---- task-specific head: tanh(h_f @ W_task + b_task)
    task_out = jnp.tanh(jnp.dot(hf_all.astype(jnp.bfloat16), tw_ref[...],
                                preferred_element_type=jnp.float32) + tb_ref[...])

    # single lane-denser (N, 2H) writeback stream; split back in the wrapper
    packed_ref[...] = jnp.concatenate([task_out, hf_all], axis=-1)

    # ---- classifier: masked token-level NLL with split-weight logits (no feature concat)
    if CONCAT_FLAG:
        logits = (jnp.dot(task_out.astype(jnp.bfloat16), cwt_ref[...],
                          preferred_element_type=jnp.float32)
                  + jnp.dot(hf_all.astype(jnp.bfloat16), cwh_ref[...],
                            preferred_element_type=jnp.float32)
                  + cb_ref[...])                                      # (N_PAD, T)
    else:
        feats = (task_out + hf_all).astype(jnp.bfloat16)
        logits = jnp.dot(feats, cwt_ref[...],
                         preferred_element_type=jnp.float32) + cb_ref[...]

    mx = jnp.max(logits, axis=-1, keepdims=True)
    lse = mx + jnp.log(jnp.sum(jnp.exp(logits - mx), axis=-1, keepdims=True))
    onehot = (jax.lax.broadcasted_iota(jnp.int32, logits.shape, 1)
              == lab_ref[...]).astype(jnp.float32)                    # (N_PAD, T)
    tgt = jnp.sum(logits * onehot, axis=-1, keepdims=True)
    nll = (lse - tgt) * mask_all                                      # (N_PAD, 1)
    nll_sum = jnp.sum(nll, axis=0, keepdims=True)                     # (1, 1)
    denom = jnp.maximum(jnp.sum(mask_all, axis=0, keepdims=True), 1.0)
    loss_v = nll_sum / denom                                          # exact division
    loss_ref[0, 0] = loss_v[0, 0]


def fused_forward(word_e, char_pad_pm, mask_tm, lab_tm,
                  cnn_w, cnn_b, wxw, wxc, wh, rb, tw, tb, cwt, cwh, cb):
    n_in = 15
    return pl.pallas_call(
        fused_tagger_kernel,
        out_shape=(
            jax.ShapeDtypeStruct((1, 1), jnp.float32),            # loss (SMEM scalar)
            jax.ShapeDtypeStruct((N_PAD, 2 * H), jnp.float32),    # packed [task | hf]
        ),
        in_specs=[pl.BlockSpec(memory_space=pltpu.MemorySpace.VMEM) for _ in range(n_in)],
        out_specs=(
            pl.BlockSpec(memory_space=pltpu.MemorySpace.SMEM),
            pl.BlockSpec(memory_space=pltpu.MemorySpace.VMEM),
        ),
        scratch_shapes=[pltpu.VMEM((N_PAD, H), jnp.float32)],
    )(word_e, char_pad_pm, mask_tm, lab_tm, cnn_w, cnn_b,
      wxw, wxc, wh, rb, tw, tb, cwt, cwh, cb)


# ----------------------------- model glue -----------------------------
def init_params(key):
    ks = jax.random.split(key, 8)
    sc = 0.1
    return {
        "word_emb": sc * jax.random.normal(ks[0], (WORD_VOCAB, D_WORD), jnp.float32),
        "char_emb": sc * jax.random.normal(ks[1], (CHAR_VOCAB, D_CHAR), jnp.float32),
        # char CNN weight stored as (K taps, D_CHAR, F_CNN); reshaped to (K*Dc, F) for the kernel
        "cnn_w": sc * jax.random.normal(ks[2], (K, D_CHAR, F_CNN), jnp.float32),
        "cnn_b": jnp.zeros((1, F_CNN), jnp.float32),
        "rnn_wx": sc * jax.random.normal(ks[3], (D_IN, H), jnp.float32),
        "rnn_wh": sc * jax.random.normal(ks[4], (H, H), jnp.float32),
        "rnn_b": jnp.zeros((1, H), jnp.float32),
        "task_w": sc * jax.random.normal(ks[5], (N_TASKS, H, H), jnp.float32),
        "task_b": jnp.zeros((N_TASKS, 1, H), jnp.float32),
        "cls_w": sc * jax.random.normal(ks[6], (N_TASKS, D_FEAT, N_TAGS), jnp.float32),
        "cls_b": jnp.zeros((N_TASKS, 1, N_TAGS), jnp.float32),
    }


def forward(params, src_seqs, src_masks, src_feats, src_chars, tgt_seqs, tgt_masks, idx):
    del src_feats, tgt_masks  # USE_CASE=False; this classifier masks with src_masks
    bsz, seq_len = src_seqs.shape
    pad_b = B_PAD - bsz
    bf = lambda a: a.astype(jnp.bfloat16)

    # time-major (S, B) -> pad batch to B_PAD (mask=0 on pad rows) -> flatten row = t*B_PAD + b
    words_tm = jnp.transpose(src_seqs, (1, 0))                         # (S, B)
    chars_tm = jnp.transpose(src_chars, (1, 0, 2))                     # (S, B, C)
    mask_tm = jnp.pad(jnp.transpose(src_masks, (1, 0)).astype(jnp.float32),
                      ((0, 0), (0, pad_b))).reshape(seq_len * B_PAD, 1)
    lab_tm = jnp.pad(jnp.transpose(tgt_seqs, (1, 0)).astype(jnp.int32),
                     ((0, 0), (0, pad_b))).reshape(seq_len * B_PAD, 1)

    # embedding gathers stay in XLA glue (vocab tables live in HBM); operands fed as bf16
    word_embeds = jnp.take(params["word_emb"], words_tm, axis=0)       # (S, B, Dw)
    word_embeds = jnp.pad(word_embeds, ((0, 0), (0, pad_b), (0, 0)))
    word_embeds = bf(word_embeds.reshape(seq_len * B_PAD, D_WORD))

    char_embeds = jnp.take(params["char_emb"], chars_tm, axis=0)       # (S, B, C, Dc)
    char_embeds = jnp.pad(char_embeds, ((0, 0), (0, pad_b), (0, 0), (0, 0)))
    char_embeds = char_embeds.reshape(seq_len * B_PAD, C_CHAR, D_CHAR)
    conv_pad = K // 2
    char_pad = jnp.pad(char_embeds, ((0, 0), (conv_pad, conv_pad), (0, 0)))
    char_pad_pm = bf(jnp.transpose(char_pad, (1, 0, 2)))               # (C+K-1, N_PAD, Dc)

    # split weights in the wrapper so the kernel uses split-weight matmuls (no concats)
    cnn_w2d = bf(params["cnn_w"].reshape(K * D_CHAR, F_CNN))
    wx = params["rnn_wx"]
    wxw, wxc = bf(wx[:D_WORD]), bf(wx[D_WORD:])
    cw = params["cls_w"][idx]
    if CONCAT_FLAG:
        cwt, cwh = bf(cw[:H]), bf(cw[H:])
    else:
        cwt, cwh = bf(cw), jnp.zeros((H, N_TAGS), jnp.bfloat16)

    loss, packed = fused_forward(
        word_embeds, char_pad_pm, mask_tm, lab_tm,
        cnn_w2d, params["cnn_b"],
        wxw, wxc, bf(params["rnn_wh"]), params["rnn_b"],
        bf(params["task_w"][idx]), params["task_b"][idx],
        cwt, cwh, params["cls_b"][idx],
    )

    # unpack (N_PAD, 2H) -> drop batch padding -> (B, S, H)
    packed3 = packed.reshape(seq_len, B_PAD, 2 * H)[:, :bsz, :]
    final_task = jnp.transpose(packed3[..., :H], (1, 0, 2))
    h_f = jnp.transpose(packed3[..., H:], (1, 0, 2))
    h_p = jax.lax.stop_gradient(final_task)   # .detach()
    h_s = jax.lax.stop_gradient(h_f)          # .detach()
    return loss, h_p, h_s


# ----------------------------- main -----------------------------
if __name__ == "__main__":
    key = jax.random.PRNGKey(0)
    pkey, k1, k2, k3 = jax.random.split(key, 4)
    params = init_params(pkey)

    src_seqs = jax.random.randint(k1, (B, S), 0, WORD_VOCAB, dtype=jnp.int32)
    src_chars = jax.random.randint(k2, (B, S, C_CHAR), 0, CHAR_VOCAB, dtype=jnp.int32)
    tgt_seqs = jax.random.randint(k3, (B, S), 0, N_TAGS, dtype=jnp.int32)
    lengths = jnp.array([S, S - 2], dtype=jnp.int32)
    src_masks = (jnp.arange(S)[None, :] < lengths[:, None]).astype(jnp.float32)
    tgt_masks = src_masks
    src_feats = jnp.zeros((B, S), dtype=jnp.int32)  # unused (USE_CASE=False)
    idx = 0

    loss, h_p, h_s = forward(params, src_seqs, src_masks, src_feats, src_chars,
                             tgt_seqs, tgt_masks, idx)
    jax.block_until_ready((loss, h_p, h_s))
    assert loss.shape == (1, 1)
    assert h_p.shape == (B, S, H)
    assert h_s.shape == (B, S, H)
    print("KERNEL_OK")
</pallas_src>

<mosaic_0001>
module attributes {stable_mosaic.version = 11 : i64} {
  func.func @fused_tagger_kernel(%arg0: memref<64x32xbf16, #tpu.memory_space<vmem>>, %arg1: memref<14x64x16xbf16, #tpu.memory_space<vmem>>, %arg2: memref<64x1xf32, #tpu.memory_space<vmem>>, %arg3: memref<64x1xi32, #tpu.memory_space<vmem>>, %arg4: memref<48x32xbf16, #tpu.memory_space<vmem>>, %arg5: memref<1x32xf32, #tpu.memory_space<vmem>>, %arg6: memref<32x32xbf16, #tpu.memory_space<vmem>>, %arg7: memref<32x32xbf16, #tpu.memory_space<vmem>>, %arg8: memref<32x32xbf16, #tpu.memory_space<vmem>>, %arg9: memref<1x32xf32, #tpu.memory_space<vmem>>, %arg10: memref<32x32xbf16, #tpu.memory_space<vmem>>, %arg11: memref<1x32xf32, #tpu.memory_space<vmem>>, %arg12: memref<32x8xbf16, #tpu.memory_space<vmem>>, %arg13: memref<32x8xbf16, #tpu.memory_space<vmem>>, %arg14: memref<1x8xf32, #tpu.memory_space<vmem>>, %arg15: memref<1x1xf32, #tpu.memory_space<smem>>, %arg16: memref<64x64xf32, #tpu.memory_space<vmem>>, %arg17: memref<64x32xf32, #tpu.memory_space<vmem>>) attributes {dimension_semantics = [], scalar_prefetch = 0 : i64, scratch_operands = 1 : i64, tpu.core_type = #tpu.core_type<tc>} {
    %c0 = arith.constant 0 : index
    %c0_0 = arith.constant 0 : index
    %c0_1 = arith.constant 0 : index
    %0 = vector.load %arg1[%c0, %c0_0, %c0_1] : memref<14x64x16xbf16, #tpu.memory_space<vmem>>, vector<14x64x16xbf16>
    %1 = vector.extract_strided_slice %0 {offsets = [0, 0, 0], sizes = [12, 64, 16], strides = [1, 1, 1]} : vector<14x64x16xbf16> to vector<12x64x16xbf16>
    %2 = vector.shape_cast %1 : vector<12x64x16xbf16> to vector<768x16xbf16>
    %3 = vector.extract_strided_slice %0 {offsets = [1, 0, 0], sizes = [12, 64, 16], strides = [1, 1, 1]} : vector<14x64x16xbf16> to vector<12x64x16xbf16>
    %4 = vector.shape_cast %3 : vector<12x64x16xbf16> to vector<768x16xbf16>
    %5 = vector.extract_strided_slice %0 {offsets = [2, 0, 0], sizes = [12, 64, 16], strides = [1, 1, 1]} : vector<14x64x16xbf16> to vector<12x64x16xbf16>
    %6 = vector.shape_cast %5 : vector<12x64x16xbf16> to vector<768x16xbf16>
    %7 = tpu.concatenate %2, %4, %6 in 1 : vector<768x16xbf16>, vector<768x16xbf16>, vector<768x16xbf16> -> vector<768x48xbf16>
    %c0_2 = arith.constant 0 : index
    %c0_3 = arith.constant 0 : index
    %8 = vector.load %arg4[%c0_2, %c0_3] : memref<48x32xbf16, #tpu.memory_space<vmem>>, vector<48x32xbf16>
    %cst = arith.constant dense<0.000000e+00> : vector<768x32xf32>
    %9 = tpu.matmul %7, %8, %cst {dimension_numbers = #tpu.dot_dimension_numbers<[1], [0], [0], [1], [0, 0, 1, 1], [], []>} : vector<768x48xbf16>, vector<48x32xbf16>, vector<768x32xf32> -> vector<768x32xf32>
    %c0_4 = arith.constant 0 : index
    %c0_5 = arith.constant 0 : index
    %10 = vector.load %arg5[%c0_4, %c0_5] : memref<1x32xf32, #tpu.memory_space<vmem>>, vector<1x32xf32>
    %11 = vector.broadcast %10 : vector<1x32xf32> to vector<768x32xf32>
    %12 = arith.addf %9, %11 : vector<768x32xf32>
    %cst_6 = arith.constant 0.000000e+00 : f32
    %13 = vector.broadcast %cst_6 : f32 to vector<768x32xf32>
    %14 = arith.maximumf %12, %13 : vector<768x32xf32>
    %15 = vector.shape_cast %14 : vector<768x32xf32> to vector<12x64x32xf32>
    %cst_7 = arith.constant dense<0xFF800000> : vector<64x32xf32>
    %16 = vector.multi_reduction <maximumf>, %15, %cst_7 [0] : vector<12x64x32xf32> to vector<64x32xf32>
    %c0_8 = arith.constant 0 : index
    %c0_9 = arith.constant 0 : index
    %17 = vector.load %arg0[%c0_8, %c0_9] : memref<64x32xbf16, #tpu.memory_space<vmem>>, vector<64x32xbf16>
    %c0_10 = arith.constant 0 : index
    %c0_11 = arith.constant 0 : index
    %18 = vector.load %arg6[%c0_10, %c0_11] : memref<32x32xbf16, #tpu.memory_space<vmem>>, vector<32x32xbf16>
    %cst_12 = arith.constant dense<0.000000e+00> : vector<64x32xf32>
    %19 = tpu.matmul %17, %18, %cst_12 {dimension_numbers = #tpu.dot_dimension_numbers<[1], [0], [0], [1], [0, 0, 1, 1], [], []>} : vector<64x32xbf16>, vector<32x32xbf16>, vector<64x32xf32> -> vector<64x32xf32>
    %20 = arith.truncf %16 : vector<64x32xf32> to vector<64x32xbf16>
    %c0_13 = arith.constant 0 : index
    %c0_14 = arith.constant 0 : index
    %21 = vector.load %arg7[%c0_13, %c0_14] : memref<32x32xbf16, #tpu.memory_space<vmem>>, vector<32x32xbf16>
    %cst_15 = arith.constant dense<0.000000e+00> : vector<64x32xf32>
    %22 = tpu.matmul %20, %21, %cst_15 {dimension_numbers = #tpu.dot_dimension_numbers<[1], [0], [0], [1], [0, 0, 1, 1], [], []>} : vector<64x32xbf16>, vector<32x32xbf16>, vector<64x32xf32> -> vector<64x32xf32>
    %23 = arith.addf %19, %22 : vector<64x32xf32>
    %c0_16 = arith.constant 0 : index
    %c0_17 = arith.constant 0 : index
    %24 = vector.load %arg9[%c0_16, %c0_17] : memref<1x32xf32, #tpu.memory_space<vmem>>, vector<1x32xf32>
    %25 = vector.broadcast %24 : vector<1x32xf32> to vector<64x32xf32>
    %26 = arith.addf %23, %25 : vector<64x32xf32>
    %c0_18 = arith.constant 0 : index
    %c0_19 = arith.constant 0 : index
    %27 = vector.load %arg8[%c0_18, %c0_19] : memref<32x32xbf16, #tpu.memory_space<vmem>>, vector<32x32xbf16>
    %c0_20 = arith.constant 0 : index
    %c0_21 = arith.constant 0 : index
    %28 = vector.load %arg2[%c0_20, %c0_21] : memref<64x1xf32, #tpu.memory_space<vmem>>, vector<64x1xf32>
    %cst_22 = arith.constant 1.000000e+00 : f32
    %29 = vector.broadcast %cst_22 : f32 to vector<64x1xf32>
    %30 = arith.subf %29, %28 : vector<64x1xf32>
    %cst_23 = arith.constant 0.000000e+00 : f32
    %31 = vector.broadcast %cst_23 : f32 to vector<8x32xf32>
    %32 = vector.extract_strided_slice %26 {offsets = [0, 0], sizes = [8, 32], strides = [1, 1]} : vector<64x32xf32> to vector<8x32xf32>
    %33 = vector.extract_strided_slice %28 {offsets = [0, 0], sizes = [8, 1], strides = [1, 1]} : vector<64x1xf32> to vector<8x1xf32>
    %34 = vector.extract_strided_slice %30 {offsets = [0, 0], sizes = [8, 1], strides = [1, 1]} : vector<64x1xf32> to vector<8x1xf32>
    %35 = arith.truncf %31 : vector<8x32xf32> to vector<8x32xbf16>
    %cst_24 = arith.constant dense<0.000000e+00> : vector<8x32xf32>
    %36 = tpu.matmul %35, %27, %cst_24 {dimension_numbers = #tpu.dot_dimension_numbers<[1], [0], [0], [1], [0, 0, 1, 1], [], []>} : vector<8x32xbf16>, vector<32x32xbf16>, vector<8x32xf32> -> vector<8x32xf32>
    %37 = arith.addf %32, %36 : vector<8x32xf32>
    %38 = math.tanh %37 : vector<8x32xf32>
    %39 = vector.broadcast %33 : vector<8x1xf32> to vector<8x32xf32>
    %40 = arith.mulf %39, %38 : vector<8x32xf32>
    %41 = vector.broadcast %34 : vector<8x1xf32> to vector<8x32xf32>
    %42 = arith.mulf %41, %31 : vector<8x32xf32>
    %43 = arith.addf %40, %42 : vector<8x32xf32>
    %44 = vector.broadcast %33 : vector<8x1xf32> to vector<8x32xf32>
    %45 = arith.mulf %44, %43 : vector<8x32xf32>
    %c0_25 = arith.constant 0 : index
    %c0_26 = arith.constant 0 : index
    %46 = vector.load %arg17[%c0_25, %c0_26] : memref<64x32xf32, #tpu.memory_space<vmem>>, vector<8x32xf32>
    tpu.vector_store %arg17[%c0_25, %c0_26], %45 {strides = array<i32>} : memref<64x32xf32, #tpu.memory_space<vmem>>, vector<8x32xf32>,
    %47 = vector.extract_strided_slice %26 {offsets = [8, 0], sizes = [8, 32], strides = [1, 1]} : vector<64x32xf32> to vector<8x32xf32>
    %48 = vector.extract_strided_slice %28 {offsets = [8, 0], sizes = [8, 1], strides = [1, 1]} : vector<64x1xf32> to vector<8x1xf32>
    %49 = vector.extract_strided_slice %30 {offsets = [8, 0], sizes = [8, 1], strides = [1, 1]} : vector<64x1xf32> to vector<8x1xf32>
    %50 = arith.truncf %43 : vector<8x32xf32> to vector<8x32xbf16>
    %cst_27 = arith.constant dense<0.000000e+00> : vector<8x32xf32>
    %51 = tpu.matmul %50, %27, %cst_27 {dimension_numbers = #tpu.dot_dimension_numbers<[1], [0], [0], [1], [0, 0, 1, 1], [], []>} : vector<8x32xbf16>, vector<32x32xbf16>, vector<8x32xf32> -> vector<8x32xf32>
    %52 = arith.addf %47, %51 : vector<8x32xf32>
    %53 = math.tanh %52 : vector<8x32xf32>
    %54 = vector.broadcast %48 : vector<8x1xf32> to vector<8x32xf32>
    %55 = arith.mulf %54, %53 : vector<8x32xf32>
    %56 = vector.broadcast %49 : vector<8x1xf32> to vector<8x32xf32>
    %57 = arith.mulf %56, %43 : vector<8x32xf32>
    %58 = arith.addf %55, %57 : vector<8x32xf32>
    %59 = vector.broadcast %48 : vector<8x1xf32> to vector<8x32xf32>
    %60 = arith.mulf %59, %58 : vector<8x32xf32>
    %c8 = arith.constant 8 : index
    %c0_28 = arith.constant 0 : index
    %61 = vector.load %arg17[%c8, %c0_28] : memref<64x32xf32, #tpu.memory_space<vmem>>, vector<8x32xf32>
    tpu.vector_store %arg17[%c8, %c0_28], %60 {strides = array<i32>} : memref<64x32xf32, #tpu.memory_space<vmem>>, vector<8x32xf32>,
    %62 = vector.extract_strided_slice %26 {offsets = [16, 0], sizes = [8, 32], strides = [1, 1]} : vector<64x32xf32> to vector<8x32xf32>
    %63 = vector.extract_strided_slice %28 {offsets = [16, 0], sizes = [8, 1], strides = [1, 1]} : vector<64x1xf32> to vector<8x1xf32>
    %64 = vector.extract_strided_slice %30 {offsets = [16, 0], sizes = [8, 1], strides = [1, 1]} : vector<64x1xf32> to vector<8x1xf32>
    %65 = arith.truncf %58 : vector<8x32xf32> to vector<8x32xbf16>
    %cst_29 = arith.constant dense<0.000000e+00> : vector<8x32xf32>
    %66 = tpu.matmul %65, %27, %cst_29 {dimension_numbers = #tpu.dot_dimension_numbers<[1], [0], [0], [1], [0, 0, 1, 1], [], []>} : vector<8x32xbf16>, vector<32x32xbf16>, vector<8x32xf32> -> vector<8x32xf32>
    %67 = arith.addf %62, %66 : vector<8x32xf32>
    %68 = math.tanh %67 : vector<8x32xf32>
    %69 = vector.broadcast %63 : vector<8x1xf32> to vector<8x32xf32>
    %70 = arith.mulf %69, %68 : vector<8x32xf32>
    %71 = vector.broadcast %64 : vector<8x1xf32> to vector<8x32xf32>
    %72 = arith.mulf %71, %58 : vector<8x32xf32>
    %73 = arith.addf %70, %72 : vector<8x32xf32>
    %74 = vector.broadcast %63 : vector<8x1xf32> to vector<8x32xf32>
    %75 = arith.mulf %74, %73 : vector<8x32xf32>
    %c16 = arith.constant 16 : index
    %c0_30 = arith.constant 0 : index
    %76 = vector.load %arg17[%c16, %c0_30] : memref<64x32xf32, #tpu.memory_space<vmem>>, vector<8x32xf32>
    tpu.vector_store %arg17[%c16, %c0_30], %75 {strides = array<i32>} : memref<64x32xf32, #tpu.memory_space<vmem>>, vector<8x32xf32>,
    %77 = vector.extract_strided_slice %26 {offsets = [24, 0], sizes = [8, 32], strides = [1, 1]} : vector<64x32xf32> to vector<8x32xf32>
    %78 = vector.extract_strided_slice %28 {offsets = [24, 0], sizes = [8, 1], strides = [1, 1]} : vector<64x1xf32> to vector<8x1xf32>
    %79 = vector.extract_strided_slice %30 {offsets = [24, 0], sizes = [8, 1], strides = [1, 1]} : vector<64x1xf32> to vector<8x1xf32>
    %80 = arith.truncf %73 : vector<8x32xf32> to vector<8x32xbf16>
    %cst_31 = arith.constant dense<0.000000e+00> : vector<8x32xf32>
    %81 = tpu.matmul %80, %27, %cst_31 {dimension_numbers = #tpu.dot_dimension_numbers<[1], [0], [0], [1], [0, 0, 1, 1], [], []>} : vector<8x32xbf16>, vector<32x32xbf16>, vector<8x32xf32> -> vector<8x32xf32>
    %82 = arith.addf %77, %81 : vector<8x32xf32>
    %83 = math.tanh %82 : vector<8x32xf32>
    %84 = vector.broadcast %78 : vector<8x1xf32> to vector<8x32xf32>
    %85 = arith.mulf %84, %83 : vector<8x32xf32>
    %86 = vector.broadcast %79 : vector<8x1xf32> to vector<8x32xf32>
    %87 = arith.mulf %86, %73 : vector<8x32xf32>
    %88 = arith.addf %85, %87 : vector<8x32xf32>
    %89 = vector.broadcast %78 : vector<8x1xf32> to vector<8x32xf32>
    %90 = arith.mulf %89, %88 : vector<8x32xf32>
    %c24 = arith.constant 24 : index
    %c0_32 = arith.constant 0 : index
    %91 = vector.load %arg17[%c24, %c0_32] : memref<64x32xf32, #tpu.memory_space<vmem>>, vector<8x32xf32>
    tpu.vector_store %arg17[%c24, %c0_32], %90 {strides = array<i32>} : memref<64x32xf32, #tpu.memory_space<vmem>>, vector<8x32xf32>,
    %92 = vector.extract_strided_slice %26 {offsets = [32, 0], sizes = [8, 32], strides = [1, 1]} : vector<64x32xf32> to vector<8x32xf32>
    %93 = vector.extract_strided_slice %28 {offsets = [32, 0], sizes = [8, 1], strides = [1, 1]} : vector<64x1xf32> to vector<8x1xf32>
    %94 = vector.extract_strided_slice %30 {offsets = [32, 0], sizes = [8, 1], strides = [1, 1]} : vector<64x1xf32> to vector<8x1xf32>
    %95 = arith.truncf %88 : vector<8x32xf32> to vector<8x32xbf16>
    %cst_33 = arith.constant dense<0.000000e+00> : vector<8x32xf32>
    %96 = tpu.matmul %95, %27, %cst_33 {dimension_numbers = #tpu.dot_dimension_numbers<[1], [0], [0], [1], [0, 0, 1, 1], [], []>} : vector<8x32xbf16>, vector<32x32xbf16>, vector<8x32xf32> -> vector<8x32xf32>
    %97 = arith.addf %92, %96 : vector<8x32xf32>
    %98 = math.tanh %97 : vector<8x32xf32>
    %99 = vector.broadcast %93 : vector<8x1xf32> to vector<8x32xf32>
    %100 = arith.mulf %99, %98 : vector<8x32xf32>
    %101 = vector.broadcast %94 : vector<8x1xf32> to vector<8x32xf32>
    %102 = arith.mulf %101, %88 : vector<8x32xf32>
    %103 = arith.addf %100, %102 : vector<8x32xf32>
    %104 = vector.broadcast %93 : vector<8x1xf32> to vector<8x32xf32>
    %105 = arith.mulf %104, %103 : vector<8x32xf32>
    %c32 = arith.constant 32 : index
    %c0_34 = arith.constant 0 : index
    %106 = vector.load %arg17[%c32, %c0_34] : memref<64x32xf32, #tpu.memory_space<vmem>>, vector<8x32xf32>
    tpu.vector_store %arg17[%c32, %c0_34], %105 {strides = array<i32>} : memref<64x32xf32, #tpu.memory_space<vmem>>, vector<8x32xf32>,
    %107 = vector.extract_strided_slice %26 {offsets = [40, 0], sizes = [8, 32], strides = [1, 1]} : vector<64x32xf32> to vector<8x32xf32>
    %108 = vector.extract_strided_slice %28 {offsets = [40, 0], sizes = [8, 1], strides = [1, 1]} : vector<64x1xf32> to vector<8x1xf32>
    %109 = vector.extract_strided_slice %30 {offsets = [40, 0], sizes = [8, 1], strides = [1, 1]} : vector<64x1xf32> to vector<8x1xf32>
    %110 = arith.truncf %103 : vector<8x32xf32> to vector<8x32xbf16>
    %cst_35 = arith.constant dense<0.000000e+00> : vector<8x32xf32>
    %111 = tpu.matmul %110, %27, %cst_35 {dimension_numbers = #tpu.dot_dimension_numbers<[1], [0], [0], [1], [0, 0, 1, 1], [], []>} : vector<8x32xbf16>, vector<32x32xbf16>, vector<8x32xf32> -> vector<8x32xf32>
    %112 = arith.addf %107, %111 : vector<8x32xf32>
    %113 = math.tanh %112 : vector<8x32xf32>
    %114 = vector.broadcast %108 : vector<8x1xf32> to vector<8x32xf32>
    %115 = arith.mulf %114, %113 : vector<8x32xf32>
    %116 = vector.broadcast %109 : vector<8x1xf32> to vector<8x32xf32>
    %117 = arith.mulf %116, %103 : vector<8x32xf32>
    %118 = arith.addf %115, %117 : vector<8x32xf32>
    %119 = vector.broadcast %108 : vector<8x1xf32> to vector<8x32xf32>
    %120 = arith.mulf %119, %118 : vector<8x32xf32>
    %c40 = arith.constant 40 : index
    %c0_36 = arith.constant 0 : index
    %121 = vector.load %arg17[%c40, %c0_36] : memref<64x32xf32, #tpu.memory_space<vmem>>, vector<8x32xf32>
    tpu.vector_store %arg17[%c40, %c0_36], %120 {strides = array<i32>} : memref<64x32xf32, #tpu.memory_space<vmem>>, vector<8x32xf32>,
    %122 = vector.extract_strided_slice %26 {offsets = [48, 0], sizes = [8, 32], strides = [1, 1]} : vector<64x32xf32> to vector<8x32xf32>
    %123 = vector.extract_strided_slice %28 {offsets = [48, 0], sizes = [8, 1], strides = [1, 1]} : vector<64x1xf32> to vector<8x1xf32>
    %124 = vector.extract_strided_slice %30 {offsets = [48, 0], sizes = [8, 1], strides = [1, 1]} : vector<64x1xf32> to vector<8x1xf32>
    %125 = arith.truncf %118 : vector<8x32xf32> to vector<8x32xbf16>
    %cst_37 = arith.constant dense<0.000000e+00> : vector<8x32xf32>
    %126 = tpu.matmul %125, %27, %cst_37 {dimension_numbers = #tpu.dot_dimension_numbers<[1], [0], [0], [1], [0, 0, 1, 1], [], []>} : vector<8x32xbf16>, vector<32x32xbf16>, vector<8x32xf32> -> vector<8x32xf32>
    %127 = arith.addf %122, %126 : vector<8x32xf32>
    %128 = math.tanh %127 : vector<8x32xf32>
    %129 = vector.broadcast %123 : vector<8x1xf32> to vector<8x32xf32>
    %130 = arith.mulf %129, %128 : vector<8x32xf32>
    %131 = vector.broadcast %124 : vector<8x1xf32> to vector<8x32xf32>
    %132 = arith.mulf %131, %118 : vector<8x32xf32>
    %133 = arith.addf %130, %132 : vector<8x32xf32>
    %134 = vector.broadcast %123 : vector<8x1xf32> to vector<8x32xf32>
    %135 = arith.mulf %134, %133 : vector<8x32xf32>
    %c48 = arith.constant 48 : index
    %c0_38 = arith.constant 0 : index
    %136 = vector.load %arg17[%c48, %c0_38] : memref<64x32xf32, #tpu.memory_space<vmem>>, vector<8x32xf32>
    tpu.vector_store %arg17[%c48, %c0_38], %135 {strides = array<i32>} : memref<64x32xf32, #tpu.memory_space<vmem>>, vector<8x32xf32>,
    %137 = vector.extract_strided_slice %26 {offsets = [56, 0], sizes = [8, 32], strides = [1, 1]} : vector<64x32xf32> to vector<8x32xf32>
    %138 = vector.extract_strided_slice %28 {offsets = [56, 0], sizes = [8, 1], strides = [1, 1]} : vector<64x1xf32> to vector<8x1xf32>
    %139 = vector.extract_strided_slice %30 {offsets = [56, 0], sizes = [8, 1], strides = [1, 1]} : vector<64x1xf32> to vector<8x1xf32>
    %140 = arith.truncf %133 : vector<8x32xf32> to vector<8x32xbf16>
    %cst_39 = arith.constant dense<0.000000e+00> : vector<8x32xf32>
    %141 = tpu.matmul %140, %27, %cst_39 {dimension_numbers = #tpu.dot_dimension_numbers<[1], [0], [0], [1], [0, 0, 1, 1], [], []>} : vector<8x32xbf16>, vector<32x32xbf16>, vector<8x32xf32> -> vector<8x32xf32>
    %142 = arith.addf %137, %141 : vector<8x32xf32>
    %143 = math.tanh %142 : vector<8x32xf32>
    %144 = vector.broadcast %138 : vector<8x1xf32> to vector<8x32xf32>
    %145 = arith.mulf %144, %143 : vector<8x32xf32>
    %146 = vector.broadcast %139 : vector<8x1xf32> to vector<8x32xf32>
    %147 = arith.mulf %146, %133 : vector<8x32xf32>
    %148 = arith.addf %145, %147 : vector<8x32xf32>
    %149 = vector.broadcast %138 : vector<8x1xf32> to vector<8x32xf32>
    %150 = arith.mulf %149, %148 : vector<8x32xf32>
    %c56 = arith.constant 56 : index
    %c0_40 = arith.constant 0 : index
    %151 = vector.load %arg17[%c56, %c0_40] : memref<64x32xf32, #tpu.memory_space<vmem>>, vector<8x32xf32>
    tpu.vector_store %arg17[%c56, %c0_40], %150 {strides = array<i32>} : memref<64x32xf32, #tpu.memory_space<vmem>>, vector<8x32xf32>,
    %c0_41 = arith.constant 0 : index
    %c0_42 = arith.constant 0 : index
    %152 = vector.load %arg17[%c0_41, %c0_42] : memref<64x32xf32, #tpu.memory_space<vmem>>, vector<64x32xf32>
    %153 = arith.truncf %152 : vector<64x32xf32> to vector<64x32xbf16>
    %c0_43 = arith.constant 0 : index
    %c0_44 = arith.constant 0 : index
    %154 = vector.load %arg10[%c0_43, %c0_44] : memref<32x32xbf16, #tpu.memory_space<vmem>>, vector<32x32xbf16>
    %cst_45 = arith.constant dense<0.000000e+00> : vector<64x32xf32>
    %155 = tpu.matmul %153, %154, %cst_45 {dimension_numbers = #tpu.dot_dimension_numbers<[1], [0], [0], [1], [0, 0, 1, 1], [], []>} : vector<64x32xbf16>, vector<32x32xbf16>, vector<64x32xf32> -> vector<64x32xf32>
    %c0_46 = arith.constant 0 : index
    %c0_47 = arith.constant 0 : index
    %156 = vector.load %arg11[%c0_46, %c0_47] : memref<1x32xf32, #tpu.memory_space<vmem>>, vector<1x32xf32>
    %157 = vector.broadcast %156 : vector<1x32xf32> to vector<64x32xf32>
    %158 = arith.addf %155, %157 : vector<64x32xf32>
    %159 = math.tanh %158 : vector<64x32xf32>
    %160 = tpu.concatenate %159, %152 in 1 : vector<64x32xf32>, vector<64x32xf32> -> vector<64x64xf32>
    %c0_48 = arith.constant 0 : index
    %c0_49 = arith.constant 0 : index
    %161 = vector.load %arg16[%c0_48, %c0_49] : memref<64x64xf32, #tpu.memory_space<vmem>>, vector<64x64xf32>
    tpu.vector_store %arg16[%c0_48, %c0_49], %160 {strides = array<i32>} : memref<64x64xf32, #tpu.memory_space<vmem>>, vector<64x64xf32>,
    %162 = arith.truncf %159 : vector<64x32xf32> to vector<64x32xbf16>
    %c0_50 = arith.constant 0 : index
    %c0_51 = arith.constant 0 : index
    %163 = vector.load %arg12[%c0_50, %c0_51] : memref<32x8xbf16, #tpu.memory_space<vmem>>, vector<32x8xbf16>
    %cst_52 = arith.constant dense<0.000000e+00> : vector<64x8xf32>
    %164 = tpu.matmul %162, %163, %cst_52 {dimension_numbers = #tpu.dot_dimension_numbers<[1], [0], [0], [1], [0, 0, 1, 1], [], []>} : vector<64x32xbf16>, vector<32x8xbf16>, vector<64x8xf32> -> vector<64x8xf32>
    %165 = arith.truncf %152 : vector<64x32xf32> to vector<64x32xbf16>
    %c0_53 = arith.constant 0 : index
    %c0_54 = arith.constant 0 : index
    %166 = vector.load %arg13[%c0_53, %c0_54] : memref<32x8xbf16, #tpu.memory_space<vmem>>, vector<32x8xbf16>
    %cst_55 = arith.constant dense<0.000000e+00> : vector<64x8xf32>
    %167 = tpu.matmul %165, %166, %cst_55 {dimension_numbers = #tpu.dot_dimension_numbers<[1], [0], [0], [1], [0, 0, 1, 1], [], []>} : vector<64x32xbf16>, vector<32x8xbf16>, vector<64x8xf32> -> vector<64x8xf32>
    %168 = arith.addf %164, %167 : vector<64x8xf32>
    %c0_56 = arith.constant 0 : index
    %c0_57 = arith.constant 0 : index
    %169 = vector.load %arg14[%c0_56, %c0_57] : memref<1x8xf32, #tpu.memory_space<vmem>>, vector<1x8xf32>
    %170 = vector.broadcast %169 : vector<1x8xf32> to vector<64x8xf32>
    %171 = arith.addf %168, %170 : vector<64x8xf32>
    %cst_58 = arith.constant dense<0xFF800000> : vector<64xf32>
    %172 = vector.multi_reduction <maximumf>, %171, %cst_58 [1] : vector<64x8xf32> to vector<64xf32>
    %173 = vector.shape_cast %172 : vector<64xf32> to vector<64x1xf32>
    %174 = vector.broadcast %173 : vector<64x1xf32> to vector<64x8xf32>
    %175 = arith.subf %171, %174 : vector<64x8xf32>
    %176 = math.exp %175 : vector<64x8xf32>
    %cst_59 = arith.constant dense<0.000000e+00> : vector<64xf32>
    %177 = vector.multi_reduction <add>, %176, %cst_59 [1] : vector<64x8xf32> to vector<64xf32>
    %178 = vector.shape_cast %177 : vector<64xf32> to vector<64x1xf32>
    %179 = math.log %178 : vector<64x1xf32>
    %180 = arith.addf %173, %179 : vector<64x1xf32>
    %181 = tpu.iota {dimensions = array<i32: 1>} : vector<64x8xi32>
    %c0_60 = arith.constant 0 : index
    %c0_61 = arith.constant 0 : index
    %182 = vector.load %arg3[%c0_60, %c0_61] : memref<64x1xi32, #tpu.memory_space<vmem>>, vector<64x1xi32>
    %183 = vector.broadcast %182 : vector<64x1xi32> to vector<64x8xi32>
    %184 = arith.cmpi eq, %181, %183 : vector<64x8xi32>
    %185 = arith.extui %184 : vector<64x8xi1> to vector<64x8xi32>
    %186 = arith.sitofp %185 : vector<64x8xi32> to vector<64x8xf32>
    %187 = arith.mulf %171, %186 : vector<64x8xf32>
    %cst_62 = arith.constant dense<0.000000e+00> : vector<64xf32>
    %188 = vector.multi_reduction <add>, %187, %cst_62 [1] : vector<64x8xf32> to vector<64xf32>
    %189 = vector.shape_cast %188 : vector<64xf32> to vector<64x1xf32>
    %190 = arith.subf %180, %189 : vector<64x1xf32>
    %191 = arith.mulf %190, %28 : vector<64x1xf32>
    %cst_63 = arith.constant dense<0.000000e+00> : vector<1xf32>
    %192 = vector.multi_reduction <add>, %191, %cst_63 [0] : vector<64x1xf32> to vector<1xf32>
    %193 = vector.shape_cast %192 : vector<1xf32> to vector<1x1xf32>
    %cst_64 = arith.constant dense<0.000000e+00> : vector<1xf32>
    %194 = vector.multi_reduction <add>, %28, %cst_64 [0] : vector<64x1xf32> to vector<1xf32>
    %195 = vector.shape_cast %194 : vector<1xf32> to vector<1x1xf32>
    %cst_65 = arith.constant 1.000000e+00 : f32
    %196 = vector.broadcast %cst_65 : f32 to vector<1x1xf32>
    %197 = arith.maximumf %195, %196 : vector<1x1xf32>
    %198 = arith.divf %193, %197 : vector<1x1xf32>
    %199 = vector.extract %198[0, 0] : f32 from vector<1x1xf32>
    %c0_66 = arith.constant 0 : index
    %c0_67 = arith.constant 0 : index
    %200 = memref.load %arg15[%c0_66, %c0_67] : memref<1x1xf32, #tpu.memory_space<smem>>
    memref.store %199, %arg15[%c0_66, %c0_67] : memref<1x1xf32, #tpu.memory_space<smem>>
    return
  }
}

</mosaic_0001>

<bundles_post_ra>
// kernel: tpu_custom_call.1
= control target key start
LH: loop header
LB: loop body
LE: loop exit
PB: predicated region body
PF: predicated region fallthrough
CT: control target
= control target key end

     0   :  { %s5367_s0 = inlined_call_operand.vmem [shape: bf16[64,32], index: 0, kind: input, shape index: {}]   ;;  %s5368_s1 = inlined_call_operand.vmem [shape: bf16[14,64,16], index: 1, kind: input, shape index: {}]   ;;  %s5369_s2 = inlined_call_operand.vmem [shape: f32[64,1], index: 2, kind: input, shape index: {}]   ;;  %s5370_s3 = inlined_call_operand.vmem [shape: s32[64,1], index: 3, kind: input, shape index: {}]   ;;  %s5371_s4 = inlined_call_operand.vmem [shape: bf16[48,32], index: 4, kind: input, shape index: {}]   ;;  %s5372_s5 = inlined_call_operand.vmem [shape: f32[1,32], index: 5, kind: input, shape index: {}]   ;;  %s5373_s6 = inlined_call_operand.vmem [shape: bf16[32,32], index: 6, kind: input, shape index: {}]   ;;  %s5374_s7 = inlined_call_operand.vmem [shape: bf16[32,32], index: 7, kind: input, shape index: {}]   ;;  %s5375_s8 = inlined_call_operand.vmem [shape: bf16[32,32], index: 8, kind: input, shape index: {}]   ;;  %s5376_s9 = inlined_call_operand.vmem [shape: f32[1,32], index: 9, kind: input, shape index: {}]   ;;  %s5377_s10 = inlined_call_operand.vmem [shape: bf16[32,32], index: 10, kind: input, shape index: {}]   ;;  %s5378_s11 = inlined_call_operand.vmem [shape: f32[1,32], index: 11, kind: input, shape index: {}]   ;;  %s5379_s12 = inlined_call_operand.vmem [shape: bf16[32,8], index: 12, kind: input, shape index: {}]   ;;  %s5380_s13 = inlined_call_operand.vmem [shape: bf16[32,8], index: 13, kind: input, shape index: {}]   ;;  %s5381_s14 = inlined_call_operand.vmem [shape: f32[1,8], index: 14, kind: input, shape index: {}]   ;;  %s5382_s15 = inlined_call_operand.hbm [shape: f32[1,1], index: 15, kind: output, shape index: {0}]   ;;  %s5383_s16 = inlined_call_operand.hbm [shape: f32[64,64], index: 16, kind: output, shape index: {1}]  }
   0x1   :  { %5385 = sst [smem:[#allocation9_spill]] %s5367_s0 }
   0x2   :  { %22 = vsyncpa [#allocation5], 0  ;;  %v3912_v0 = vld [vmem:[%s5368_s1 + $0x40] sm:$0xff]   ;;  %s3815_s25 = smov 32   ;;  %v3924_v2 = vld [vmem:[%s5368_s1 + $0x48] sm:$0xff]   ;;  %s3816_s28 = smov 16  }
   0x3   :  { %v3917_v1 = vld [vmem:[%s5368_s1 + $0x20] sm:$0xff]   ;;  %543 = vrot.lane.b32.xlu1 %v3912_v0, %s3815_s25  ;;  %v3931_v3 = vld [vmem:[%s5368_s1 + $0x28] sm:$0xff]   ;;  %v3938_v4 = vld [vmem:[%s5368_s1 + $0x38] sm:$0xff]  }
   0x4   :  { %427 = vrot.lane.b32.xlu0 %v3917_v1, %s3816_s28  ;;  %v3945_v5 = vld [vmem:[%s5368_s1 + $0x30] sm:$0xff]   ;;  %v3952_v6 = vld [vmem:[%s5368_s1 + $0x58] sm:$0xff]   ;;  %v3970_v8 = vld [vmem:[%s5368_s1 + $0x68] sm:$0xff]  }
   0x5   :  { %v3959_v7 = vld [vmem:[%s5368_s1 + $0x50] sm:$0xff]   ;;  %v3977_v9 = vld [vmem:[%s5368_s1 + $0x60] sm:$0xff]   ;;  %v3988_v10 = vld [vmem:[%s5368_s1 + $0x78] sm:$0xff]  }
   0x6   :  { %v3995_v11 = vld [vmem:[%s5368_s1 + $0x70] sm:$0xff]   ;;  %v3661_v12 = vld [vmem:[%s5371_s4] sm:$0xff]   ;;  %v3662_v13 = vld [vmem:[%s5371_s4 + $0x8] sm:$0xff]  }
   0x7   :  { %545 = vrot.lane.b32.xlu1 %v3924_v2, %s3815_s25  ;;  %v4012_v14 = vld [vmem:[%s5368_s1 + $0x88] sm:$0xff]   ;;  %3368 = vmatprep.subr.bf16.mxu0 %v3661_v12  ;;  %v4019_v15 = vld [vmem:[%s5368_s1 + $0x80] sm:$0xff]   ;;  %v3666_v16 = vld [vmem:[%s5371_s4 + $0x10] sm:$0xff]  }
   0x8   :  { %429 = vrot.lane.b32.xlu0 %v3931_v3, %s3816_s28  ;;  %3369 = vmatpush3.bf16.msra.mxu0 %v3661_v12  ;;  %v4033_v17 = vld [vmem:[%s5368_s1 + $0x98] sm:$0xff]   ;;  %v4040_v18 = vld [vmem:[%s5368_s1 + $0x90] sm:$0xff]   ;;  %v4051_v19 = vld [vmem:[%s5368_s1 + $0xa8] sm:$0xff]  }
   0x9   :  { %3370 = vmatprep.subr.bf16.mxu0 %v3662_v13  ;;  %3594 = vmatprep.subr.bf16.mxu1 %v3661_v12  ;;  %v4058_v20 = vld [vmem:[%s5368_s1 + $0xa0] sm:$0xff]   ;;  %v4067_v21 = vld [vmem:[%s5368_s1 + $0xb8] sm:$0xff]   ;;  %v4072_v22 = vld [vmem:[%s5368_s1 + $0xb0] sm:$0xff]  }
   0xa   :  { %3597 = vmatpush3.bf16.msra.mxu1 %v3661_v12  ;;  %v4085_v23 = vld [vmem:[%s5368_s1 + $0xc8] sm:$0xff]   ;;  %v4090_v24 = vld [vmem:[%s5368_s1 + $0xc0] sm:$0xff]  }
   0xb   :  { %433 = vrot.lane.b32.xlu1 %v3938_v4, %s3816_s28  ;;  %3595 = vmatprep.subr.bf16.mxu1 %v3662_v13 }
   0xc   :  { %431 = vrot.lane.b32.xlu0 %v3945_v5, %s3816_s28  ;;  %3371 = vmatpush3.bf16.msra.mxu0 %v3662_v13 }
   0xd   :  { %3372 = vmatprep.subr.bf16.mxu0 %v3666_v16 }
   0xe   :  { %3598 = vmatpush3.bf16.msra.mxu1 %v3662_v13 }
   0xf   :  { %549 = vrot.lane.b32.xlu1 %v3952_v6, %s3815_s25  ;;  %3596 = vmatprep.subr.bf16.mxu1 %v3666_v16 }
  0x10   :  { %547 = vrot.lane.b32.xlu0 %v3959_v7, %s3815_s25  ;;  %3373 = vmatpush3.bf16.msra.mxu0 %v3666_v16 }
  0x12   :  { %3599 = vmatpush3.bf16.msra.mxu1 %v3666_v16 }
  0x13   :  { %437 = vrot.lane.b32.xlu1 %v3924_v2, %s3816_s28 }
  0x14   :  { %435 = vrot.lane.b32.xlu0 %v3912_v0, %s3816_s28 }
  0x17   :  { %553 = vrot.lane.b32.xlu1 %v3970_v8, %s3815_s25 }
  0x18   :  { %551 = vrot.lane.b32.xlu0 %v3977_v9, %s3815_s25 }
  0x1b   :  { %441 = vrot.lane.b32.xlu1 %v3952_v6, %s3816_s28 }
  0x1c   :  { %439 = vrot.lane.b32.xlu0 %v3959_v7, %s3816_s28 }
  0x1f   :  { %557 = vrot.lane.b32.xlu1 %v3988_v10, %s3815_s25 }
  0x20   :  { %555 = vrot.lane.b32.xlu0 %v3995_v11, %s3815_s25 }
  0x23   :  { %445 = vrot.lane.b32.xlu1 %v3970_v8, %s3816_s28 }
  0x24   :  { %443 = vrot.lane.b32.xlu0 %v3977_v9, %s3816_s28 }
  0x27   :  { %561 = vrot.lane.b32.xlu1 %v4012_v14, %s3815_s25 }
  0x28   :  { %559 = vrot.lane.b32.xlu0 %v4019_v15, %s3815_s25 }
  0x2b   :  { %449 = vrot.lane.b32.xlu1 %v3988_v10, %s3816_s28 }
  0x2c   :  { %447 = vrot.lane.b32.xlu0 %v3995_v11, %s3816_s28 }
  0x2f   :  { %565 = vrot.lane.b32.xlu1 %v4033_v17, %s3815_s25 }
  0x30   :  { %563 = vrot.lane.b32.xlu0 %v4040_v18, %s3815_s25 }
  0x33   :  { %453 = vrot.lane.b32.xlu1 %v4012_v14, %s3816_s28 }
  0x34   :  { %451 = vrot.lane.b32.xlu0 %v4019_v15, %s3816_s28 }
  0x37   :  { %569 = vrot.lane.b32.xlu1 %v4051_v19, %s3815_s25 }
  0x38   :  { %567 = vrot.lane.b32.xlu0 %v4058_v20, %s3815_s25 }
  0x3b   :  { %457 = vrot.lane.b32.xlu1 %v4033_v17, %s3816_s28 }
  0x3c   :  { %455 = vrot.lane.b32.xlu0 %v4040_v18, %s3816_s28 }
  0x3f   :  { %573 = vrot.lane.b32.xlu1 %v4067_v21, %s3815_s25 }
  0x40   :  { %571 = vrot.lane.b32.xlu0 %v4072_v22, %s3815_s25 }
  0x43   :  { %461 = vrot.lane.b32.xlu1 %v4051_v19, %s3816_s28 }
  0x44   :  { %459 = vrot.lane.b32.xlu0 %v4058_v20, %s3816_s28 }
  0x45   :  { %23 = vsyncpa [#allocation4], 0  ;;  %v4105_v25 = vld [vmem:[%s5368_s1 + $0xd8] sm:$0xff]   ;;  %v4112_v26 = vld [vmem:[%s5368_s1 + $0xd0] sm:$0xff]   ;;  %vm639_vm0 = vcmask 130048   ;;  %vm784_vm1 = vcmask 261120  }
  0x46   :  { %v4123_v27 = vld [vmem:[%s5368_s1 + $0xe8] sm:$0xff]   ;;  %v4130_v28 = vld [vmem:[%s5368_s1 + $0xe0] sm:$0xff]   ;;  %v4141_v29 = vld [vmem:[%s5368_s1 + $0xf8] sm:$0xff]   ;;  %vm912_vm2 = vcmask 392192   ;;  %s5386_s4 = sld [smem:[#allocation9_spill]]  ;;  %vm3819_vm3 = vmmov 0  }
  0x47   :  { %577 = vrot.lane.b32.xlu1 %v4085_v23, %s3815_s25  ;;  %v4148_v30 = vld [vmem:[%s5368_s1 + $0xf0] sm:$0xff]   ;;  %v4159_v31 = vld [vmem:[%s5368_s1 + $0x108] sm:$0xff]   ;;  %v4166_v32 = vld [vmem:[%s5368_s1 + $0x100] sm:$0xff]   ;;  %vm2820_vm4 = vcmask 64512   ;;  %vm3023_vm13 = vcmask 7168   ;;  %vm2618_vm14 = vcmask 523264  }
  0x48   :  { %575 = vrot.lane.b32.xlu0 %v4090_v24, %s3815_s25  ;;  %v4177_v33 = vld [vmem:[%s5368_s1 + $0x118] sm:$0xff]   ;;  %v4184_v34 = vld [vmem:[%s5368_s1 + $0x110] sm:$0xff]   ;;  %v3663_v35 = vld [vmem:[%s5368_s1] sm:$0xff]  }
  0x49   :  { %v4198_v36 = vld [vmem:[%s5368_s1 + $0x128] sm:$0xff]   ;;  %v4205_v37 = vld [vmem:[%s5368_s1 + $0x120] sm:$0xff]   ;;  %v4223_v46 = vld [vmem:[%s5368_s1 + $0x138] sm:$0xff]  }
  0x4a   :  { %v3667_v41 = vld [vmem:[%s5368_s1 + $0x8] sm:$0xff]   ;;  %v4231_v48 = vld [vmem:[%s5368_s1 + $0x130] sm:$0xff]   ;;  %v3668_v50 = vld [vmem:[%s5368_s1 + $0x18] sm:$0xff]  }
  0x4b   :  { %465 = vrot.lane.b32.xlu1 %v4067_v21, %s3816_s28  ;;  %v3669_v52 = vld [vmem:[%s5368_s1 + $0x10] sm:$0xff]   ;;  %v4253_v59 = vld [vmem:[%s5368_s1 + $0x148] sm:$0xff]   ;;  %v4261_v60 = vld [vmem:[%s5368_s1 + $0x140] sm:$0xff]  }
  0x4c   :  { %463 = vrot.lane.b32.xlu0 %v4072_v22, %s3816_s28 }
  0x4f   :  { %581 = vrot.lane.b32.xlu1 %v4105_v25, %s3815_s25 }
  0x50   :  { %579 = vrot.lane.b32.xlu0 %v4112_v26, %s3815_s25 }
  0x53   :  { %469 = vrot.lane.b32.xlu1 %v4085_v23, %s3816_s28 }
  0x54   :  { %467 = vrot.lane.b32.xlu0 %v4090_v24, %s3816_s28 }
  0x57   :  { %585 = vrot.lane.b32.xlu1 %v4123_v27, %s3815_s25 }
  0x58   :  { %583 = vrot.lane.b32.xlu0 %v4130_v28, %s3815_s25 }
  0x5b   :  { %473 = vrot.lane.b32.xlu1 %v4105_v25, %s3816_s28 }
  0x5c   :  { %471 = vrot.lane.b32.xlu0 %v4112_v26, %s3816_s28 }
  0x5f   :  { %589 = vrot.lane.b32.xlu1 %v4141_v29, %s3815_s25 }
  0x60   :  { %587 = vrot.lane.b32.xlu0 %v4148_v30, %s3815_s25 }
  0x63   :  { %477 = vrot.lane.b32.xlu1 %v4123_v27, %s3816_s28 }
  0x64   :  { %475 = vrot.lane.b32.xlu0 %v4130_v28, %s3816_s28 }
  0x67   :  { %593 = vrot.lane.b32.xlu1 %v4159_v31, %s3815_s25 }
  0x68   :  { %591 = vrot.lane.b32.xlu0 %v4166_v32, %s3815_s25 }
  0x6b   :  { %481 = vrot.lane.b32.xlu1 %v4141_v29, %s3816_s28 }
  0x6c   :  { %479 = vrot.lane.b32.xlu0 %v4148_v30, %s3816_s28 }
  0x6f   :  { %597 = vrot.lane.b32.xlu1 %v4177_v33, %s3815_s25 }
  0x70   :  { %595 = vrot.lane.b32.xlu0 %v4184_v34, %s3815_s25 }
  0x73   :  { %485 = vrot.lane.b32.xlu1 %v4159_v31, %s3816_s28 }
  0x74   :  { %483 = vrot.lane.b32.xlu0 %v4166_v32, %s3816_s28 }
  0x75   :  { %v544_v38 = vpop.permute.xlu1 %543 }
  0x76   :  { %v428_v39 = vpop.permute.xlu0 %427 }
  0x77   :  { %v642_v40 = vsel %vm639_vm0, %v3663_v35, %v428_v39  ;;  %601 = vrot.lane.b32.xlu1 %v4198_v36, %s3815_s25  ;;  %v4279_v39 = vld [vmem:[%s5368_s1 + $0x158] sm:$0xff]  }
  0x78   :  { %599 = vrot.lane.b32.xlu0 %v4205_v37, %s3815_s25  ;;  %v786_v42 = vsel %vm784_vm1, %v642_v40, %v544_v38 }
  0x79   :  { %3374 = vmatprep.mubr.msk.bf16.mxu0 %vm912_vm2, %v786_v42  ;;  %v546_v43 = vpop.permute.xlu1 %545 }
  0x7a   :  { %v430_v44 = vpop.permute.xlu0 %429 }
  0x7b   :  { %v645_v45 = vsel %vm639_vm0, %v3667_v41, %v430_v44  ;;  %489 = vrot.lane.b32.xlu1 %v4177_v33, %s3816_s28 }
  0x7c   :  { %487 = vrot.lane.b32.xlu0 %v4184_v34, %s3816_s28  ;;  %v788_v47 = vsel %vm784_vm1, %v645_v45, %v546_v43 }
  0x7d   :  { %3375 = vmatmul.mubr.msk.bf16.vlgmr.msra.gmra.mrb[0].mxu0 %vm912_vm2, %v788_v47  ;;  %v434_v49 = vpop.permute.xlu1 %433 }
  0x7e   :  { %v432_v51 = vpop.permute.xlu0 %431  ;;  %v651_v53 = vsel %vm639_vm0, %v3668_v50, %v434_v49  ;;  %v4305_v49 = vld [vmem:[%s5368_s1 + $0x168] sm:$0xff]  }
  0x7f   :  { %605 = vrot.lane.b32.xlu1 %v4223_v46, %s3815_s25  ;;  %v648_v55 = vsel %vm639_vm0, %v3669_v52, %v432_v51 }
  0x80   :  { %603 = vrot.lane.b32.xlu0 %v4231_v48, %s3815_s25 }
  0x81   :  { %v550_v54 = vpop.permute.xlu1 %549 }
  0x82   :  { %v792_v56 = vsel %vm784_vm1, %v651_v53, %v550_v54  ;;  %v548_v57 = vpop.permute.xlu0 %547 }
  0x83   :  { %v790_v58 = vsel %vm784_vm1, %v648_v55, %v548_v57  ;;  %493 = vrot.lane.b32.xlu1 %v4198_v36, %s3816_s28  ;;  %v4331_v57 = vld [vmem:[%s5368_s1 + $0x170] sm:$0xff]  }
  0x84   :  { %491 = vrot.lane.b32.xlu0 %v4205_v37, %s3816_s28  ;;  %3378 = vmatprep.mubr.msk.bf16.mxu0 %vm912_vm2, %v790_v58  ;;  %v4342_v58 = vld [vmem:[%s5368_s1 + $0x178] sm:$0xff]  }
  0x85   :  { %3379 = vmatmul.mubr.msk.bf16.gmra.mrb[4].mxu0 %vm912_vm2, %v792_v56  ;;  %v438_v61 = vpop.permute.xlu1 %437 }
  0x86   :  { %v436_v62 = vpop.permute.xlu0 %435  ;;  %v657_v63 = vsel %vm639_vm0, %v3931_v3, %v438_v61 }
  0x87   :  { %609 = vrot.lane.b32.xlu1 %v4253_v59, %s3815_s25  ;;  %v654_v13 = vsel %vm639_vm0, %v3917_v1, %v436_v62  ;;  %v4287_v1 = vld [vmem:[%s5368_s1 + $0x150] sm:$0xff]  }
  0x88   :  { %607 = vrot.lane.b32.xlu0 %v4261_v60, %s3815_s25 }
  0x89   :  { %v554_v12 = vpop.permute.xlu1 %553 }
  0x8a   :  { %v796_v16 = vsel %vm784_vm1, %v657_v63, %v554_v12  ;;  %v552_v35 = vpop.permute.xlu0 %551 }
  0x8b   :  { %v794_v38 = vsel %vm784_vm1, %v654_v13, %v552_v35  ;;  %497 = vrot.lane.b32.xlu1 %v4223_v46, %s3816_s28  ;;  %v3680_v35 = vld [vmem:[%s5368_s1 + $0x198] sm:$0xff]  }
  0x8c   :  { %495 = vrot.lane.b32.xlu0 %v4231_v48, %s3816_s28  ;;  %3382 = vmatprep.mubr.msk.bf16.mxu0 %vm912_vm2, %v794_v38 }
  0x8d   :  { %3383 = vmatmul.mubr.msk.bf16.gmra.mrb[8].mxu0 %vm912_vm2, %v796_v16  ;;  %v442_v3 = vpop.permute.xlu1 %441 }
  0x8e   :  { %v440_v40 = vpop.permute.xlu0 %439  ;;  %v663_v41 = vsel %vm639_vm0, %v3938_v4, %v442_v3  ;;  %v4313_v4 = vld [vmem:[%s5368_s1 + $0x160] sm:$0xff]  }
  0x8f   :  { %613 = vrot.lane.b32.xlu1 %v4279_v39, %s3815_s25  ;;  %v660_v43 = vsel %vm639_vm0, %v3945_v5, %v440_v40 }
  0x90   :  { %611 = vrot.lane.b32.xlu0 %v4287_v1, %s3815_s25 }
  0x91   :  { %v558_v42 = vpop.permute.xlu1 %557 }
  0x92   :  { %v800_v44 = vsel %vm784_vm1, %v663_v41, %v558_v42  ;;  %v556_v45 = vpop.permute.xlu0 %555 }
  0x93   :  { %v798_v47 = vsel %vm784_vm1, %v660_v43, %v556_v45  ;;  %501 = vrot.lane.b32.xlu1 %v4253_v59, %s3816_s28  ;;  %v3682_v45 = vld [vmem:[%s5368_s1 + $0x180] sm:$0xff]  }
  0x94   :  { %499 = vrot.lane.b32.xlu0 %v4261_v60, %s3816_s28  ;;  %3386 = vmatprep.mubr.msk.bf16.mxu0 %vm912_vm2, %v798_v47  ;;  %v3683_v47 = vld [vmem:[%s5368_s1 + $0x188] sm:$0xff]  }
  0x95   :  { %3387 = vmatmul.mubr.msk.bf16.gmra.mrb[12].mxu0 %vm912_vm2, %v800_v44  ;;  %v446_v5 = vpop.permute.xlu1 %445 }
  0x96   :  { %v444_v50 = vpop.permute.xlu0 %443  ;;  %v669_v51 = vsel %vm639_vm0, %v3924_v2, %v446_v5 }
  0x97   :  { %617 = vrot.lane.b32.xlu1 %v4305_v49, %s3815_s25  ;;  %v666_v53 = vsel %vm639_vm0, %v3912_v0, %v444_v50 }
  0x98   :  { %615 = vrot.lane.b32.xlu0 %v4313_v4, %s3815_s25 }
  0x99   :  { %v562_v52 = vpop.permute.xlu1 %561 }
  0x9a   :  { %v804_v54 = vsel %vm784_vm1, %v669_v51, %v562_v52  ;;  %v560_v55 = vpop.permute.xlu0 %559 }
  0x9b   :  { %v802_v56 = vsel %vm784_vm1, %v666_v53, %v560_v55  ;;  %505 = vrot.lane.b32.xlu1 %v4279_v39, %s3816_s28  ;;  %v3684_v55 = vld [vmem:[%s5368_s1 + $0x1a8] sm:$0xff]  }
  0x9c   :  { %503 = vrot.lane.b32.xlu0 %v4287_v1, %s3816_s28  ;;  %3390 = vmatprep.mubr.msk.bf16.mxu0 %vm912_vm2, %v802_v56 }
  0x9d   :  { %3391 = vmatmul.mubr.msk.bf16.gmra.mrb[16].mxu0 %vm912_vm2, %v804_v54  ;;  %v450_v0 = vpop.permute.xlu1 %449 }
  0x9e   :  { %v448_v2 = vpop.permute.xlu0 %447  ;;  %v675_v61 = vsel %vm639_vm0, %v3952_v6, %v450_v0  ;;  %v3681_v6 = vld [vmem:[%s5368_s1 + $0x190] sm:$0xff]  }
  0x9f   :  { %511 = vrot.lane.b32.xlu1 %v4331_v57, %s3816_s28  ;;  %v672_v63 = vsel %vm639_vm0, %v3959_v7, %v448_v2 }
  0xa0   :  { %619 = vrot.lane.b32.xlu0 %v4331_v57, %s3815_s25 }
  0xa1   :  { %v566_v62 = vpop.permute.xlu1 %565 }
  0xa2   :  { %v808_v12 = vsel %vm784_vm1, %v675_v61, %v566_v62  ;;  %v564_v13 = vpop.permute.xlu0 %563 }
  0xa3   :  { %v806_v16 = vsel %vm784_vm1, %v672_v63, %v564_v13  ;;  %513 = vrot.lane.b32.xlu1 %v4342_v58, %s3816_s28  ;;  %v3686_v13 = vld [vmem:[%s5368_s1 + $0x1b8] sm:$0xff]  }
  0xa4   :  { %621 = vrot.lane.b32.xlu0 %v4342_v58, %s3815_s25  ;;  %3394 = vmatprep.mubr.msk.bf16.mxu0 %vm912_vm2, %v806_v16 }
  0xa5   :  { %3395 = vmatmul.mubr.msk.bf16.gmra.mrb[20].mxu0 %vm912_vm2, %v808_v12  ;;  %v454_v7 = vpop.permute.xlu1 %453 }
  0xa6   :  { %v452_v38 = vpop.permute.xlu0 %451  ;;  %v681_v3 = vsel %vm639_vm0, %v3970_v8, %v454_v7 }
  0xa7   :  { %629 = vrot.lane.b32.xlu1 %v3680_v35, %s3815_s25  ;;  %v678_v41 = vsel %vm639_vm0, %v3977_v9, %v452_v38 }
  0xa8   :  { %627 = vrot.lane.b32.xlu0 %v3681_v6, %s3815_s25 }
  0xa9   :  { %v570_v40 = vpop.permute.xlu1 %569 }
  0xaa   :  { %v812_v42 = vsel %vm784_vm1, %v681_v3, %v570_v40  ;;  %v568_v43 = vpop.permute.xlu0 %567 }
  0xab   :  { %v810_v44 = vsel %vm784_vm1, %v678_v41, %v568_v43  ;;  %509 = vrot.lane.b32.xlu1 %v4305_v49, %s3816_s28 }
  0xac   :  { %507 = vrot.lane.b32.xlu0 %v4313_v4, %s3816_s28  ;;  %3398 = vmatprep.mubr.msk.bf16.mxu0 %vm912_vm2, %v810_v44 }
  0xad   :  { %3399 = vmatmul.mubr.msk.bf16.gmra.mrb[24].mxu0 %vm912_vm2, %v812_v42  ;;  %v458_v8 = vpop.permute.xlu1 %457 }
  0xae   :  { %v456_v9 = vpop.permute.xlu0 %455  ;;  %v687_v5 = vsel %vm639_vm0, %v3988_v10, %v458_v8  ;;  %v3685_v10 = vld [vmem:[%s5368_s1 + $0x1a0] sm:$0xff]  }
  0xaf   :  { %515 = vrot.lane.b32.xlu1 %v3682_v45, %s3816_s28  ;;  %v684_v51 = vsel %vm639_vm0, %v3995_v11, %v456_v9 }
  0xb0   :  { %623 = vrot.lane.b32.xlu0 %v3682_v45, %s3815_s25 }
  0xb1   :  { %v574_v50 = vpop.permute.xlu1 %573 }
  0xb2   :  { %v816_v52 = vsel %vm784_vm1, %v687_v5, %v574_v50  ;;  %v572_v53 = vpop.permute.xlu0 %571 }
  0xb3   :  { %v814_v54 = vsel %vm784_vm1, %v684_v51, %v572_v53  ;;  %517 = vrot.lane.b32.xlu1 %v3683_v47, %s3816_s28 }
  0xb4   :  { %625 = vrot.lane.b32.xlu0 %v3683_v47, %s3815_s25  ;;  %3402 = vmatprep.mubr.msk.bf16.mxu0 %vm912_vm2, %v814_v54 }
  0xb5   :  { %3403 = vmatmul.mubr.msk.bf16.gmra.mrb[28].mxu0 %vm912_vm2, %v816_v52  ;;  %v462_v11 = vpop.permute.xlu1 %461 }
  0xb6   :  { %v460_v56 = vpop.permute.xlu0 %459  ;;  %v693_v0 = vsel %vm639_vm0, %v4012_v14, %v462_v11  ;;  %v3687_v14 = vld [vmem:[%s5368_s1 + $0x1b0] sm:$0xff]  }
  0xb7   :  { %633 = vrot.lane.b32.xlu1 %v3684_v55, %s3815_s25  ;;  %v690_v61 = vsel %vm639_vm0, %v4019_v15, %v460_v56 }
  0xb8   :  { %631 = vrot.lane.b32.xlu0 %v3685_v10, %s3815_s25 }
  0xb9   :  { %v578_v2 = vpop.permute.xlu1 %577 }
  0xba   :  { %v820_v62 = vsel %vm784_vm1, %v693_v0, %v578_v2  ;;  %v576_v63 = vpop.permute.xlu0 %575 }
  0xbb   :  { %v818_v12 = vsel %vm784_vm1, %v690_v61, %v576_v63  ;;  %521 = vrot.lane.b32.xlu1 %v3680_v35, %s3816_s28 }
  0xbc   :  { %519 = vrot.lane.b32.xlu0 %v3681_v6, %s3816_s28  ;;  %3406 = vmatprep.mubr.msk.bf16.mxu0 %vm912_vm2, %v818_v12 }
  0xbd   :  { %3407 = vmatmul.mubr.msk.bf16.gmra.mrb[32].mxu0 %vm912_vm2, %v820_v62  ;;  %v466_v15 = vpop.permute.xlu1 %465 }
  0xbe   :  { %v464_v16 = vpop.permute.xlu0 %463  ;;  %v699_v35 = vsel %vm639_vm0, %v4033_v17, %v466_v15 }
  0xbf   :  { %637 = vrot.lane.b32.xlu1 %v3686_v13, %s3815_s25  ;;  %v696_v6 = vsel %vm639_vm0, %v4040_v18, %v464_v16 }
  0xc0   :  { %635 = vrot.lane.b32.xlu0 %v3687_v14, %s3815_s25 }
  0xc1   :  { %v582_v7 = vpop.permute.xlu1 %581 }
  0xc2   :  { %v824_v38 = vsel %vm784_vm1, %v699_v35, %v582_v7  ;;  %v580_v3 = vpop.permute.xlu0 %579 }
  0xc3   :  { %v822_v40 = vsel %vm784_vm1, %v696_v6, %v580_v3 }
  0xc4   :  { %3410 = vmatprep.mubr.msk.bf16.mxu0 %vm912_vm2, %v822_v40 }
  0xc5   :  { %3411 = vmatmul.mubr.msk.bf16.gmra.mrb[36].mxu0 %vm912_vm2, %v824_v38  ;;  %v470_v41 = vpop.permute.xlu1 %469 }
  0xc6   :  { %v468_v42 = vpop.permute.xlu0 %467  ;;  %v705_v43 = vsel %vm639_vm0, %v4051_v19, %v470_v41 }
  0xc7   :  { %v702_v17 = vsel %vm639_vm0, %v4058_v20, %v468_v42 }
  0xc9   :  { %v586_v44 = vpop.permute.xlu1 %585 }
  0xca   :  { %v828_v18 = vsel %vm784_vm1, %v705_v43, %v586_v44  ;;  %v584_v45 = vpop.permute.xlu0 %583 }
  0xcb   :  { %v826_v8 = vsel %vm784_vm1, %v702_v17, %v584_v45 }
  0xcc   :  { %3414 = vmatprep.mubr.msk.bf16.mxu0 %vm912_vm2, %v826_v8 }
  0xcd   :  { %3415 = vmatmul.mubr.msk.bf16.gmra.mrb[40].mxu0 %vm912_vm2, %v828_v18  ;;  %v474_v9 = vpop.permute.xlu1 %473 }
  0xce   :  { %v472_v47 = vpop.permute.xlu0 %471  ;;  %v711_v5 = vsel %vm639_vm0, %v4067_v21, %v474_v9 }
  0xcf   :  { %v708_v19 = vsel %vm639_vm0, %v4072_v22, %v472_v47 }
  0xd1   :  { %v590_v50 = vpop.permute.xlu1 %589 }
  0xd2   :  { %v832_v20 = vsel %vm784_vm1, %v711_v5, %v590_v50  ;;  %v588_v51 = vpop.permute.xlu0 %587 }
  0xd3   :  { %v830_v52 = vsel %vm784_vm1, %v708_v19, %v588_v51 }
  0xd4   :  { %3418 = vmatprep.mubr.msk.bf16.mxu0 %vm912_vm2, %v830_v52 }
  0xd5   :  { %3419 = vmatmul.mubr.msk.bf16.gmra.mrb[44].mxu0 %vm912_vm2, %v832_v20  ;;  %v478_v53 = vpop.permute.xlu1 %477 }
  0xd6   :  { %v476_v54 = vpop.permute.xlu0 %475  ;;  %v717_v55 = vsel %vm639_vm0, %v4085_v23, %v478_v53 }
  0xd7   :  { %v714_v21 = vsel %vm639_vm0, %v4090_v24, %v476_v54 }
  0xd9   :  { %v594_v10 = vpop.permute.xlu1 %593 }
  0xda   :  { %v836_v22 = vsel %vm784_vm1, %v717_v55, %v594_v10  ;;  %v592_v11 = vpop.permute.xlu0 %591 }
  0xdb   :  { %v834_v56 = vsel %vm784_vm1, %v714_v21, %v592_v11 }
  0xdc   :  { %3422 = vmatprep.mubr.msk.bf16.mxu0 %vm912_vm2, %v834_v56 }
  0xdd   :  { %3423 = vmatmul.mubr.msk.bf16.gmra.mrb[48].mxu0 %vm912_vm2, %v836_v22  ;;  %v482_v0 = vpop.permute.xlu1 %481 }
  0xde   :  { %v480_v2 = vpop.permute.xlu0 %479  ;;  %v723_v61 = vsel %vm639_vm0, %v4105_v25, %v482_v0 }
  0xdf   :  { %v720_v23 = vsel %vm639_vm0, %v4112_v26, %v480_v2 }
  0xe1   :  { %v598_v62 = vpop.permute.xlu1 %597 }
  0xe2   :  { %v840_v24 = vsel %vm784_vm1, %v723_v61, %v598_v62  ;;  %v596_v63 = vpop.permute.xlu0 %595 }
  0xe3   :  { %v838_v12 = vsel %vm784_vm1, %v720_v23, %v596_v63 }
  0xe4   :  { %3426 = vmatprep.mubr.msk.bf16.mxu0 %vm912_vm2, %v838_v12 }
  0xe5   :  { %3427 = vmatmul.mubr.msk.bf16.gmra.mrb[52].mxu0 %vm912_vm2, %v840_v24  ;;  %v486_v13 = vpop.permute.xlu1 %485 }
  0xe6   :  { %v484_v14 = vpop.permute.xlu0 %483  ;;  %v729_v15 = vsel %vm639_vm0, %v4123_v27, %v486_v13 }
  0xe7   :  { %v726_v25 = vsel %vm639_vm0, %v4130_v28, %v484_v14 }
  0xe9   :  { %v602_v16 = vpop.permute.xlu1 %601 }
  0xea   :  { %v844_v26 = vsel %vm784_vm1, %v729_v15, %v602_v16  ;;  %v600_v35 = vpop.permute.xlu0 %599 }
  0xeb   :  { %v842_v7 = vsel %vm784_vm1, %v726_v25, %v600_v35 }
  0xec   :  { %3430 = vmatprep.mubr.msk.bf16.mxu0 %vm912_vm2, %v842_v7 }
  0xed   :  { %3431 = vmatmul.mubr.msk.bf16.gmra.mrb[56].mxu0 %vm912_vm2, %v844_v26  ;;  %v490_v6 = vpop.permute.xlu1 %489 }
  0xee   :  { %v488_v38 = vpop.permute.xlu0 %487  ;;  %v735_v3 = vsel %vm639_vm0, %v4141_v29, %v490_v6 }
  0xef   :  { %v732_v27 = vsel %vm639_vm0, %v4148_v30, %v488_v38 }
  0xf1   :  { %v606_v40 = vpop.permute.xlu1 %605 }
  0xf2   :  { %v848_v28 = vsel %vm784_vm1, %v735_v3, %v606_v40  ;;  %v604_v41 = vpop.permute.xlu0 %603 }
  0xf3   :  { %v846_v42 = vsel %vm784_vm1, %v732_v27, %v604_v41 }
  0xf4   :  { %3434 = vmatprep.mubr.msk.bf16.mxu0 %vm912_vm2, %v846_v42 }
  0xf5   :  { %3435 = vmatmul.mubr.msk.bf16.gmra.mrb[60].mxu0 %vm912_vm2, %v848_v28  ;;  %v494_v43 = vpop.permute.xlu1 %493 }
  0xf6   :  { %v492_v44 = vpop.permute.xlu0 %491  ;;  %v741_v17 = vsel %vm639_vm0, %v4159_v31, %v494_v43 }
  0xf7   :  { %v738_v29 = vsel %vm639_vm0, %v4166_v32, %v492_v44 }
  0xf9   :  { %v610_v18 = vpop.permute.xlu1 %609 }
  0xfa   :  { %v852_v30 = vsel %vm784_vm1, %v741_v17, %v610_v18  ;;  %v608_v45 = vpop.permute.xlu0 %607 }
  0xfb   :  { %v850_v8 = vsel %vm784_vm1, %v738_v29, %v608_v45 }
  0xfc   :  { %3438 = vmatprep.mubr.msk.bf16.mxu0 %vm912_vm2, %v850_v8 }
  0xfd   :  { %3439 = vmatmul.mubr.msk.bf16.gmra.mrb[64].mxu0 %vm912_vm2, %v852_v30  ;;  %v498_v9 = vpop.permute.xlu1 %497 }
  0xfe   :  { %v496_v47 = vpop.permute.xlu0 %495  ;;  %v747_v5 = vsel %vm639_vm0, %v4177_v33, %v498_v9 }
  0xff   :  { %v744_v31 = vsel %vm639_vm0, %v4184_v34, %v496_v47 }
 0x101   :  { %v614_v50 = vpop.permute.xlu1 %613 }
 0x102   :  { %v856_v32 = vsel %vm784_vm1, %v747_v5, %v614_v50  ;;  %v612_v19 = vpop.permute.xlu0 %611 }
 0x103   :  { %v854_v20 = vsel %vm784_vm1, %v744_v31, %v612_v19 }
 0x104   :  { %3442 = vmatprep.mubr.msk.bf16.mxu0 %vm912_vm2, %v854_v20 }
 0x105   :  { %3443 = vmatmul.mubr.msk.bf16.gmra.mrb[68].mxu0 %vm912_vm2, %v856_v32  ;;  %v502_v51 = vpop.permute.xlu1 %501 }
 0x106   :  { %v500_v52 = vpop.permute.xlu0 %499  ;;  %v753_v53 = vsel %vm639_vm0, %v4198_v36, %v502_v51 }
 0x107   :  { %v750_v33 = vsel %vm639_vm0, %v4205_v37, %v500_v52 }
 0x109   :  { %v618_v54 = vpop.permute.xlu1 %617 }
 0x10a   :  { %v860_v34 = vsel %vm784_vm1, %v753_v53, %v618_v54  ;;  %v616_v55 = vpop.permute.xlu0 %615 }
 0x10b   :  { %v858_v10 = vsel %vm784_vm1, %v750_v33, %v616_v55 }
 0x10c   :  { %3446 = vmatprep.mubr.msk.bf16.mxu0 %vm912_vm2, %v858_v10 }
 0x10d   :  { %3447 = vmatmul.mubr.msk.bf16.gmra.mrb[72].mxu0 %vm912_vm2, %v860_v34  ;;  %v506_v21 = vpop.permute.xlu1 %505 }
 0x10e   :  { %v504_v22 = vpop.permute.xlu0 %503  ;;  %v759_v2 = vsel %vm639_vm0, %v4223_v46, %v506_v21 }
 0x10f   :  { %v756_v56 = vsel %vm639_vm0, %v4231_v48, %v504_v22 }
 0x111   :  { %v512_v11 = vpop.permute.xlu1 %511 }
 0x112   :  { %v620_v36 = vpop.permute.xlu0 %619  ;;  %v768_v48 = vsel %vm639_vm0, %v4287_v1, %v512_v11 }
 0x113   :  { %v862_v0 = vsel %vm784_vm1, %v756_v56, %v620_v36 }
 0x114   :  { %3450 = vmatprep.mubr.msk.bf16.mxu0 %vm912_vm2, %v862_v0 }
 0x115   :  { %v514_v37 = vpop.permute.xlu1 %513 }
 0x116   :  { %v622_v61 = vpop.permute.xlu0 %621  ;;  %v771_v23 = vsel %vm639_vm0, %v4279_v39, %v514_v37 }
 0x117   :  { %v864_v62 = vsel %vm784_vm1, %v759_v2, %v622_v61 }
 0x118   :  { %3451 = vmatmul.mubr.msk.bf16.gmra.mrb[76].mxu0 %vm912_vm2, %v864_v62 }
 0x119   :  { %v630_v24 = vpop.permute.xlu1 %629 }
 0x11a   :  { %v872_v63 = vsel %vm784_vm1, %v771_v23, %v630_v24  ;;  %v628_v12 = vpop.permute.xlu0 %627 }
 0x11b   :  { %v870_v13 = vsel %vm784_vm1, %v768_v48, %v628_v12 }
 0x11c   :  { %3458 = vmatprep.mubr.msk.bf16.mxu1 %vm912_vm2, %v870_v13 }
 0x11d   :  { %3459 = vmatmul.mubr.msk.bf16.vlgmr.msra.gmra.mrb[0].mxu1 %vm912_vm2, %v872_v63  ;;  %v510_v46 = vpop.permute.xlu1 %509 }
 0x11e   :  { %v508_v14 = vpop.permute.xlu0 %507  ;;  %v765_v26 = vsel %vm639_vm0, %v4253_v59, %v510_v46 }
 0x11f   :  { %v762_v16 = vsel %vm639_vm0, %v4261_v60, %v508_v14 }
 0x121   :  { %v516_v15 = vpop.permute.xlu1 %515 }
 0x122   :  { %v624_v39 = vpop.permute.xlu0 %623  ;;  %v774_v60 = vsel %vm639_vm0, %v4313_v4, %v516_v15 }
 0x123   :  { %v866_v25 = vsel %vm784_vm1, %v762_v16, %v624_v39 }
 0x124   :  { %3454 = vmatprep.mubr.msk.bf16.mxu0 %vm912_vm2, %v866_v25 }
 0x125   :  { %v518_v1 = vpop.permute.xlu1 %517 }
 0x126   :  { %v626_v35 = vpop.permute.xlu0 %625  ;;  %v777_v6 = vsel %vm639_vm0, %v4305_v49, %v518_v1 }
 0x127   :  { %v868_v7 = vsel %vm784_vm1, %v765_v26, %v626_v35 }
 0x128   :  { %3455 = vmatmul.mubr.msk.bf16.gmra.mrb[80].mxu0 %vm912_vm2, %v868_v7 }
 0x129   :  { %v634_v38 = vpop.permute.xlu1 %633 }
 0x12a   :  { %v876_v3 = vsel %vm784_vm1, %v777_v6, %v634_v38  ;;  %v632_v40 = vpop.permute.xlu0 %631 }
 0x12b   :  { %v874_v27 = vsel %vm784_vm1, %v774_v60, %v632_v40 }
 0x12c   :  { %3462 = vmatprep.mubr.msk.bf16.mxu1 %vm912_vm2, %v874_v27 }
 0x12d   :  { %3463 = vmatmul.mubr.msk.bf16.gmra.mrb[4].mxu1 %vm912_vm2, %v876_v3  ;;  %v522_v59 = vpop.permute.xlu1 %521 }
 0x12e   :  { %v520_v28 = vpop.permute.xlu0 %519  ;;  %v783_v41 = vsel %vm639_vm0, %v4342_v58, %v522_v59  ;;  %v4545_v58 = vld [vmem:[%s5372_s5] ss:$0 sm:$0xff] }
 0x12f   :  { %v780_v49 = vsel %vm639_vm0, %v4331_v57, %v520_v28 }
 0x131   :  { %v638_v42 = vpop.permute.xlu1 %637 }
 0x132   :  { %v880_v4 = vsel %vm784_vm1, %v783_v41, %v638_v42  ;;  %v636_v43 = vpop.permute.xlu0 %635 }
 0x133   :  { %v878_v44 = vsel %vm784_vm1, %v780_v49, %v636_v43 }
 0x134   :  { %3466 = vmatprep.mubr.msk.bf16.mxu1 %vm912_vm2, %v878_v44 }
 0x135   :  { %3467 = vmatmul.mubr.msk.bf16.gmra.mrb[8].mxu1 %vm912_vm2, %v880_v4 }
 0x150   :  { %v3376_v17 = vpop.f32.mrb[0].mxu0 }
 0x151   :  { %v1043_v18 = vpop.f32.mrb[1].mxu0  ;;  %v1052_v47 = vadd.f32 %v3376_v17, %v4545_v58 }
 0x152   :  { %v3377_v29 = vpop.f32.mrb[2].mxu0  ;;  %v1044_v5 = vadd.f32 %v4545_v58, %v1043_v18 }
 0x153   :  { %v1046_v30 = vpop.f32.mrb[3].mxu0  ;;  %v1055_v50 = vadd.f32 %v3377_v29, %v4545_v58  ;;  %v1428_v31 = vmax.f32 %v1052_v47, 0.0 }
 0x154   :  { %v1047_v32 = vadd.f32 %v4545_v58, %v1046_v30  ;;  %v1426_v20 = vmax.f32 %v1044_v5, 0.0 }
 0x155   :  { %v1429_v33 = vmax.f32 %v1055_v50, 0.0  ;;  %v1568_v21 = vsel %vm784_vm1, %v1428_v31, -inf }
 0x156   :  { %v1427_v22 = vmax.f32 %v1047_v32, 0.0  ;;  %v1522_v36 = vsel %vm784_vm1, %v1426_v20, -inf }
 0x157   :  { %v1591_v48 = vsel %vm784_vm1, %v1429_v33, -inf }
 0x158   :  { %v3380_v45 = vpop.f32.mrb[4].mxu0  ;;  %v1545_v46 = vsel %vm784_vm1, %v1427_v22, -inf }
 0x159   :  { %v1059_v57 = vpop.f32.mrb[5].mxu0  ;;  %v1068_v0 = vadd.f32 %v3380_v45, %v4545_v58 }
 0x15a   :  { %v3381_v8 = vpop.f32.mrb[6].mxu0  ;;  %v1060_v61 = vadd.f32 %v4545_v58, %v1059_v57 }
 0x15b   :  { %v1062_v9 = vpop.f32.mrb[7].mxu0  ;;  %v1071_v63 = vadd.f32 %v3381_v8, %v4545_v58  ;;  %v1432_v25 = vmax.f32 %v1068_v0, 0.0 }
 0x15c   :  { %v1063_v14 = vadd.f32 %v4545_v58, %v1062_v9  ;;  %v1430_v7 = vmax.f32 %v1060_v61, 0.0 }
 0x15d   :  { %v1433_v60 = vmax.f32 %v1071_v63, 0.0  ;;  %v1660_v42 = vsel %vm784_vm1, %v1432_v25, -inf }
 0x15e   :  { %v1431_v59 = vmax.f32 %v1063_v14, 0.0  ;;  %v1614_v43 = vsel %vm784_vm1, %v1430_v7, -inf }
 0x15f   :  { %v1683_v29 = vsel %vm784_vm1, %v1433_v60, -inf }
 0x160   :  { %v3384_v19 = vpop.f32.mrb[8].mxu0  ;;  %v1637_v57 = vsel %vm784_vm1, %v1431_v59, -inf }
 0x161   :  { %v1084_v51 = vadd.f32 %v3384_v19, %v4545_v58  ;;  %v1075_v52 = vpop.f32.mrb[9].mxu0 }
 0x162   :  { %v1076_v53 = vadd.f32 %v4545_v58, %v1075_v52  ;;  %v3385_v54 = vpop.f32.mrb[10].mxu0 }
 0x163   :  { %v1436_v34 = vmax.f32 %v1084_v51, 0.0  ;;  %v1087_v55 = vadd.f32 %v3385_v54, %v4545_v58  ;;  %v1078_v10 = vpop.f32.mrb[11].mxu0 }
 0x164   :  { %v1434_v11 = vmax.f32 %v1076_v53, 0.0  ;;  %v1079_v56 = vadd.f32 %v4545_v58, %v1078_v10 }
 0x165   :  { %v1569_v37 = vsel %vm784_vm1, %v1436_v34, -inf  ;;  %v1437_v2 = vmax.f32 %v1087_v55, 0.0 }
 0x166   :  { %v1570_v62 = vmax.f32 %v1568_v21, %v1569_v37  ;;  %v1523_v23 = vsel %vm784_vm1, %v1434_v11, -inf  ;;  %v1435_v24 = vmax.f32 %v1079_v56, 0.0 }
 0x167   :  { %v1524_v12 = vmax.f32 %v1522_v36, %v1523_v23  ;;  %v1592_v13 = vsel %vm784_vm1, %v1437_v2, -inf }
 0x168   :  { %v1593_v15 = vmax.f32 %v1591_v48, %v1592_v13  ;;  %v1546_v16 = vsel %vm784_vm1, %v1435_v24, -inf  ;;  %v3388_v39 = vpop.f32.mrb[12].mxu0 }
 0x169   :  { %v1547_v1 = vmax.f32 %v1545_v46, %v1546_v16  ;;  %v1100_v26 = vadd.f32 %v3388_v39, %v4545_v58  ;;  %v1091_v35 = vpop.f32.mrb[13].mxu0 }
 0x16a   :  { %v1092_v6 = vadd.f32 %v4545_v58, %v1091_v35  ;;  %v3389_v38 = vpop.f32.mrb[14].mxu0 }
 0x16b   :  { %v1440_v3 = vmax.f32 %v1100_v26, 0.0  ;;  %v1103_v40 = vadd.f32 %v3389_v38, %v4545_v58  ;;  %v1094_v27 = vpop.f32.mrb[15].mxu0 }
 0x16c   :  { %v1438_v28 = vmax.f32 %v1092_v6, 0.0  ;;  %v1095_v41 = vadd.f32 %v4545_v58, %v1094_v27 }
 0x16d   :  { %v1661_v49 = vsel %vm784_vm1, %v1440_v3, -inf  ;;  %v1441_v4 = vmax.f32 %v1103_v40, 0.0 }
 0x16e   :  { %v1662_v44 = vmax.f32 %v1660_v42, %v1661_v49  ;;  %v1615_v17 = vsel %vm784_vm1, %v1438_v28, -inf  ;;  %v1439_v18 = vmax.f32 %v1095_v41, 0.0 }
 0x16f   :  { %v1616_v30 = vmax.f32 %v1614_v43, %v1615_v17  ;;  %v1684_v45 = vsel %vm784_vm1, %v1441_v4, -inf }
 0x170   :  { %v1685_v8 = vmax.f32 %v1683_v29, %v1684_v45  ;;  %v1638_v9 = vsel %vm784_vm1, %v1439_v18, -inf  ;;  %v3392_v47 = vpop.f32.mrb[16].mxu0  ;;  %v3689_v45 = vld [vmem:[%s5374_s7 + $0x8] sm:$0xff]  }
 0x171   :  { %v1639_v5 = vmax.f32 %v1637_v57, %v1638_v9  ;;  %v1116_v50 = vadd.f32 %v3392_v47, %v4545_v58  ;;  %v1107_v31 = vpop.f32.mrb[17].mxu0 }
 0x172   :  { %v1108_v32 = vadd.f32 %v4545_v58, %v1107_v31  ;;  %v3393_v19 = vpop.f32.mrb[18].mxu0 }
 0x173   :  { %v1444_v20 = vmax.f32 %v1116_v50, 0.0  ;;  %v1119_v51 = vadd.f32 %v3393_v19, %v4545_v58  ;;  %v1110_v52 = vpop.f32.mrb[19].mxu0 }
 0x174   :  { %v1442_v53 = vmax.f32 %v1108_v32, 0.0  ;;  %v1111_v54 = vadd.f32 %v4545_v58, %v1110_v52 }
 0x175   :  { %v1571_v33 = vsel %vm784_vm1, %v1444_v20, -inf  ;;  %v1445_v34 = vmax.f32 %v1119_v51, 0.0 }
 0x176   :  { %v4584_v55 = vmax.f32 %v1570_v62, %v1571_v33  ;;  %v1525_v10 = vsel %vm784_vm1, %v1442_v53, -inf  ;;  %v1443_v21 = vmax.f32 %v1111_v54, 0.0  ;;  %v3688_v62 = vld [vmem:[%s5374_s7] sm:$0xff]  }
 0x177   :  { %v4587_v22 = vmax.f32 %v1524_v12, %v1525_v10  ;;  %v1594_v11 = vsel %vm784_vm1, %v1445_v34, -inf  ;;  %3470 = vmatprep.subr.bf16.mxu1 %v3688_v62 }
 0x178   :  { %v4590_v56 = vmax.f32 %v1593_v15, %v1594_v11  ;;  %v1548_v36 = vsel %vm784_vm1, %v1443_v21, -inf  ;;  %v3396_v0 = vpop.f32.mrb[20].mxu0  ;;  %3471 = vmatpush3.bf16.msra.mxu1 %v3688_v62 }
 0x179   :  { %v4593_v37 = vmax.f32 %v1547_v1, %v1548_v36  ;;  %v1132_v2 = vadd.f32 %v3396_v0, %v4545_v58  ;;  %v1123_v61 = vpop.f32.mrb[21].mxu0  ;;  %3472 = vmatprep.subr.bf16.mxu1 %v3689_v45 }
 0x17a   :  { %v1124_v23 = vadd.f32 %v4545_v58, %v1123_v61  ;;  %v3397_v24 = vpop.f32.mrb[22].mxu0 }
 0x17b   :  { %v1448_v48 = vmax.f32 %v1132_v2, 0.0  ;;  %v1135_v63 = vadd.f32 %v3397_v24, %v4545_v58  ;;  %v1126_v12 = vpop.f32.mrb[23].mxu0 }
 0x17c   :  { %v1446_v13 = vmax.f32 %v1124_v23, 0.0  ;;  %v1127_v46 = vadd.f32 %v4545_v58, %v1126_v12  ;;  %3473 = vmatpush3.bf16.msra.mxu1 %v3689_v45 }
 0x17d   :  { %v1663_v14 = vsel %vm784_vm1, %v1448_v48, -inf  ;;  %v1449_v15 = vmax.f32 %v1135_v63, 0.0  ;;  %v4647_v63 = vld [vmem:[%s5373_s6] sm:$0xff]  }
 0x17e   :  { %v4603_v16 = vmax.f32 %v1662_v44, %v1663_v14  ;;  %v1617_v39 = vsel %vm784_vm1, %v1446_v13, -inf  ;;  %v1447_v25 = vmax.f32 %v1127_v46, 0.0  ;;  %3482 = vmatprep.subr.bf16.mxu1 %v4647_v63 }
 0x17f   :  { %v4606_v1 = vmax.f32 %v1616_v30, %v1617_v39  ;;  %v1686_v26 = vsel %vm784_vm1, %v1449_v15, -inf }
 0x180   :  { %v4609_v35 = vmax.f32 %v1685_v8, %v1686_v26  ;;  %v1640_v7 = vsel %vm784_vm1, %v1447_v25, -inf  ;;  %v3400_v6 = vpop.f32.mrb[24].mxu0 }
 0x181   :  { %v4612_v38 = vmax.f32 %v1639_v5, %v1640_v7  ;;  %v1148_v60 = vadd.f32 %v3400_v6, %v4545_v58  ;;  %v1139_v3 = vpop.f32.mrb[25].mxu0 }
 0x182   :  { %v1140_v40 = vadd.f32 %v4545_v58, %v1139_v3  ;;  %v3401_v27 = vpop.f32.mrb[26].mxu0 }
 0x183   :  { %v1452_v59 = vmax.f32 %v1148_v60, 0.0  ;;  %v1151_v28 = vadd.f32 %v3401_v27, %v4545_v58  ;;  %v1142_v41 = vpop.f32.mrb[27].mxu0 }
 0x184   :  { %v1450_v42 = vmax.f32 %v1140_v40, 0.0  ;;  %v1143_v49 = vadd.f32 %v4545_v58, %v1142_v41 }
 0x185   :  { %v1573_v4 = vsel %vm784_vm1, %v1452_v59, -inf  ;;  %v1453_v43 = vmax.f32 %v1151_v28, 0.0 }
 0x186   :  { %v1574_v44 = vmax.f32 %v4584_v55, %v1573_v4  ;;  %v1527_v17 = vsel %vm784_vm1, %v1450_v42, -inf  ;;  %v1451_v18 = vmax.f32 %v1143_v49, 0.0 }
 0x187   :  { %v1528_v29 = vmax.f32 %v4587_v22, %v1527_v17  ;;  %v1596_v30 = vsel %vm784_vm1, %v1453_v43, -inf }
 0x188   :  { %v1597_v57 = vmax.f32 %v4590_v56, %v1596_v30  ;;  %v1550_v8 = vsel %vm784_vm1, %v1451_v18, -inf  ;;  %v3404_v9 = vpop.f32.mrb[28].mxu0 }
 0x189   :  { %v1551_v47 = vmax.f32 %v4593_v37, %v1550_v8  ;;  %v1164_v5 = vadd.f32 %v3404_v9, %v4545_v58  ;;  %v1155_v50 = vpop.f32.mrb[29].mxu0 }
 0x18a   :  { %v1156_v31 = vadd.f32 %v4545_v58, %v1155_v50  ;;  %v3405_v32 = vpop.f32.mrb[30].mxu0 }
 0x18b   :  { %v1456_v19 = vmax.f32 %v1164_v5, 0.0  ;;  %v1167_v20 = vadd.f32 %v3405_v32, %v4545_v58  ;;  %v1158_v51 = vpop.f32.mrb[31].mxu0 }
 0x18c   :  { %v1454_v52 = vmax.f32 %v1156_v31, 0.0  ;;  %v1159_v53 = vadd.f32 %v4545_v58, %v1158_v51 }
 0x18d   :  { %v1665_v54 = vsel %vm784_vm1, %v1456_v19, -inf  ;;  %v1457_v33 = vmax.f32 %v1167_v20, 0.0 }
 0x18e   :  { %v1666_v34 = vmax.f32 %v4603_v16, %v1665_v54  ;;  %v1619_v55 = vsel %vm784_vm1, %v1454_v52, -inf  ;;  %v1455_v10 = vmax.f32 %v1159_v53, 0.0 }
 0x18f   :  { %v1620_v21 = vmax.f32 %v4606_v1, %v1619_v55  ;;  %v1688_v22 = vsel %vm784_vm1, %v1457_v33, -inf }
 0x190   :  { %v1689_v11 = vmax.f32 %v4609_v35, %v1688_v22  ;;  %v1642_v56 = vsel %vm784_vm1, %v1455_v10, -inf  ;;  %v3408_v36 = vpop.f32.mrb[32].mxu0 }
 0x191   :  { %v1643_v0 = vmax.f32 %v4612_v38, %v1642_v56  ;;  %v1180_v37 = vadd.f32 %v3408_v36, %v4545_v58  ;;  %v1171_v2 = vpop.f32.mrb[33].mxu0  ;;  %v3817_v56 = vmov 0  }
 0x192   :  { %v1172_v61 = vadd.f32 %v4545_v58, %v1171_v2  ;;  %v3409_v62 = vpop.f32.mrb[34].mxu0  ;;  %3628 = vset.pattern.permute.xlu1 %v3817_v56  ;;  %3627 = vset.pattern.permute.xlu0 %v3817_v56 }
 0x193   :  { %v1460_v23 = vmax.f32 %v1180_v37, 0.0  ;;  %v1183_v24 = vadd.f32 %v3409_v62, %v4545_v58  ;;  %v1174_v48 = vpop.f32.mrb[35].mxu0 }
 0x194   :  { %v1458_v12 = vmax.f32 %v1172_v61, 0.0  ;;  %v1175_v13 = vadd.f32 %v4545_v58, %v1174_v48 }
 0x195   :  { %v1575_v46 = vsel %vm784_vm1, %v1460_v23, -inf  ;;  %v1461_v14 = vmax.f32 %v1183_v24, 0.0 }
 0x196   :  { %v4652_v15 = vmax.f32 %v1574_v44, %v1575_v46  ;;  %v1529_v16 = vsel %vm784_vm1, %v1458_v12, -inf  ;;  %v1459_v39 = vmax.f32 %v1175_v13, 0.0 }
 0x197   :  { %v4655_v25 = vmax.f32 %v1528_v29, %v1529_v16  ;;  %v1598_v1 = vsel %vm784_vm1, %v1461_v14, -inf }
 0x198   :  { %v4658_v26 = vmax.f32 %v1597_v57, %v1598_v1  ;;  %v1552_v35 = vsel %vm784_vm1, %v1459_v39, -inf  ;;  %v3412_v7 = vpop.f32.mrb[36].mxu0  ;;  %v1943_v39 = vld [vmem:[%s5369_s2] sm:$0xff] }
 0x199   :  { %v4661_v6 = vmax.f32 %v1551_v47, %v1552_v35  ;;  %v1196_v38 = vadd.f32 %v3412_v7, %v4545_v58  ;;  %v1187_v60 = vpop.f32.mrb[37].mxu0  ;;  %2018 = vperm.xlu0 %3627, %v1943_v39  }
 0x19a   :  { %v1188_v3 = vadd.f32 %v4545_v58, %v1187_v60  ;;  %v3413_v40 = vpop.f32.mrb[38].mxu0 }
 0x19b   :  { %v1464_v27 = vmax.f32 %v1196_v38, 0.0  ;;  %v1199_v59 = vadd.f32 %v3413_v40, %v4545_v58  ;;  %v1190_v28 = vpop.f32.mrb[39].mxu0  ;;  %v1944_v38 = vld [vmem:[%s5369_s2 + $0x8] sm:$0xff] }
 0x19c   :  { %v1462_v41 = vmax.f32 %v1188_v3, 0.0  ;;  %v1191_v42 = vadd.f32 %v4545_v58, %v1190_v28 }
 0x19d   :  { %v1667_v49 = vsel %vm784_vm1, %v1464_v27, -inf  ;;  %v1465_v4 = vmax.f32 %v1199_v59, 0.0  ;;  %v1952_v27 = vsub.f32 1.0, %v1944_v38 }
 0x19e   :  { %v4668_v43 = vmax.f32 %v1666_v34, %v1667_v49  ;;  %v1621_v44 = vsel %vm784_vm1, %v1462_v41, -inf  ;;  %v1463_v17 = vmax.f32 %v1191_v42, 0.0  ;;  %v1945_v41 = vld [vmem:[%s5369_s2 + $0x10] sm:$0xff] }
 0x19f   :  { %v4671_v18 = vmax.f32 %v1620_v21, %v1621_v44  ;;  %v1690_v29 = vsel %vm784_vm1, %v1465_v4, -inf  ;;  %2085 = vperm.xlu0 %3627, %v1952_v27  }
 0x1a0   :  { %v4674_v30 = vmax.f32 %v1689_v11, %v1690_v29  ;;  %v1644_v45 = vsel %vm784_vm1, %v1463_v17, -inf  ;;  %v3416_v57 = vpop.f32.mrb[40].mxu0 }
 0x1a1   :  { %v4677_v8 = vmax.f32 %v1643_v0, %v1644_v45  ;;  %v1212_v9 = vadd.f32 %v3416_v57, %v4545_v58  ;;  %v1203_v47 = vpop.f32.mrb[41].mxu0 }
 0x1a2   :  { %v1204_v5 = vadd.f32 %v4545_v58, %v1203_v47  ;;  %v3417_v50 = vpop.f32.mrb[42].mxu0 }
 0x1a3   :  { %v1468_v31 = vmax.f32 %v1212_v9, 0.0  ;;  %v1215_v32 = vadd.f32 %v3417_v50, %v4545_v58  ;;  %v1206_v19 = vpop.f32.mrb[43].mxu0 }
 0x1a4   :  { %v1466_v20 = vmax.f32 %v1204_v5, 0.0  ;;  %v1207_v51 = vadd.f32 %v4545_v58, %v1206_v19 }
 0x1a5   :  { %v1577_v52 = vsel %vm784_vm1, %v1468_v31, -inf  ;;  %v1469_v53 = vmax.f32 %v1215_v32, 0.0 }
 0x1a6   :  { %v1578_v54 = vmax.f32 %v4652_v15, %v1577_v52  ;;  %v1531_v33 = vsel %vm784_vm1, %v1466_v20, -inf  ;;  %v1467_v34 = vmax.f32 %v1207_v51, 0.0 }
 0x1a7   :  { %v1532_v55 = vmax.f32 %v4655_v25, %v1531_v33  ;;  %v1600_v10 = vsel %vm784_vm1, %v1469_v53, -inf }
 0x1a8   :  { %v1601_v21 = vmax.f32 %v4658_v26, %v1600_v10  ;;  %v1554_v22 = vsel %vm784_vm1, %v1467_v34, -inf  ;;  %v3420_v11 = vpop.f32.mrb[44].mxu0  ;;  %v1951_v26 = vsub.f32 1.0, %v1943_v39 }
 0x1a9   :  { %v1555_v36 = vmax.f32 %v4661_v6, %v1554_v22  ;;  %v1228_v0 = vadd.f32 %v3420_v11, %v4545_v58  ;;  %v1219_v37 = vpop.f32.mrb[45].mxu0 }
 0x1aa   :  { %v1220_v2 = vadd.f32 %v4545_v58, %v1219_v37  ;;  %v3421_v61 = vpop.f32.mrb[46].mxu0  ;;  %2024 = vperm.xlu1 %3628, %v1951_v26  }
 0x1ab   :  { %v1472_v62 = vmax.f32 %v1228_v0, 0.0  ;;  %v1231_v23 = vadd.f32 %v3421_v61, %v4545_v58  ;;  %v1222_v24 = vpop.f32.mrb[47].mxu0  ;;  %v1948_v61 = vld [vmem:[%s5369_s2 + $0x28] sm:$0xff] }
 0x1ac   :  { %v1470_v48 = vmax.f32 %v1220_v2, 0.0  ;;  %v1223_v12 = vadd.f32 %v4545_v58, %v1222_v24  ;;  %v1956_v24 = vsub.f32 1.0, %v1948_v61 }
 0x1ad   :  { %v1669_v13 = vsel %vm784_vm1, %v1472_v62, -inf  ;;  %v1473_v46 = vmax.f32 %v1231_v23, 0.0 }
 0x1ae   :  { %v1670_v14 = vmax.f32 %v4668_v43, %v1669_v13  ;;  %v1623_v15 = vsel %vm784_vm1, %v1470_v48, -inf  ;;  %v1471_v16 = vmax.f32 %v1223_v12, 0.0  ;;  %v1953_v43 = vsub.f32 1.0, %v1945_v41  ;;  %2079 = vperm.xlu1 %3628, %v1944_v38  }
 0x1af   :  { %v1624_v25 = vmax.f32 %v4671_v18, %v1623_v15  ;;  %v1692_v1 = vsel %vm784_vm1, %v1473_v46, -inf }
 0x1b0   :  { %v1693_v35 = vmax.f32 %v4674_v30, %v1692_v1  ;;  %v1646_v7 = vsel %vm784_vm1, %v1471_v16, -inf  ;;  %v3424_v6 = vpop.f32.mrb[48].mxu0  ;;  %2146 = vperm.xlu0 %3627, %v1953_v43  }
 0x1b1   :  { %v1647_v60 = vmax.f32 %v4677_v8, %v1646_v7  ;;  %v1244_v3 = vadd.f32 %v3424_v6, %v4545_v58  ;;  %v1235_v40 = vpop.f32.mrb[49].mxu0  ;;  %v1946_v8 = vld [vmem:[%s5369_s2 + $0x18] sm:$0xff] }
 0x1b2   :  { %v1236_v59 = vadd.f32 %v4545_v58, %v1235_v40  ;;  %v3425_v28 = vpop.f32.mrb[50].mxu0  ;;  %v1954_v5 = vsub.f32 1.0, %v1946_v8  ;;  %2140 = vperm.xlu1 %3628, %v1945_v41  }
 0x1b3   :  { %v1476_v42 = vmax.f32 %v1244_v3, 0.0  ;;  %v1247_v49 = vadd.f32 %v3425_v28, %v4545_v58  ;;  %v1238_v4 = vpop.f32.mrb[51].mxu0  ;;  %v1950_v28 = vld [vmem:[%s5369_s2 + $0x38] sm:$0xff] }
 0x1b4   :  { %v1474_v44 = vmax.f32 %v1236_v59, 0.0  ;;  %v1239_v17 = vadd.f32 %v4545_v58, %v1238_v4  ;;  %2207 = vperm.xlu0 %3627, %v1954_v5  }
 0x1b5   :  { %v1579_v18 = vsel %vm784_vm1, %v1476_v42, -inf  ;;  %v1477_v29 = vmax.f32 %v1247_v49, 0.0  ;;  %v1958_v49 = vsub.f32 1.0, %v1950_v28 }
 0x1b6   :  { %v4719_v30 = vmax.f32 %v1578_v54, %v1579_v18  ;;  %v1533_v45 = vsel %vm784_vm1, %v1474_v44, -inf  ;;  %v1475_v57 = vmax.f32 %v1239_v17, 0.0  ;;  %v1947_v54 = vld [vmem:[%s5369_s2 + $0x20] sm:$0xff]  ;;  %2201 = vperm.xlu1 %3628, %v1946_v8  }
 0x1b7   :  { %v4725_v9 = vmax.f32 %v1532_v55, %v1533_v45  ;;  %v1602_v47 = vsel %vm784_vm1, %v1477_v29, -inf  ;;  %v1955_v10 = vsub.f32 1.0, %v1947_v54 }
 0x1b8   :  { %v4728_v50 = vmax.f32 %v1601_v21, %v1602_v47  ;;  %v1556_v31 = vsel %vm784_vm1, %v1475_v57, -inf  ;;  %v3428_v32 = vpop.f32.mrb[52].mxu0 }
 0x1b9   :  { %v4731_v19 = vmax.f32 %v1555_v36, %v1556_v31  ;;  %v1260_v20 = vadd.f32 %v3428_v32, %v4545_v58  ;;  %v1251_v51 = vpop.f32.mrb[53].mxu0  ;;  %2268 = vperm.xlu0 %3627, %v1955_v10   ;;  %v2922_v10 = vld [vmem:[%s5370_s3 + $0x18] sm:$0xff] }
 0x1ba   :  { %v1252_v52 = vadd.f32 %v4545_v58, %v1251_v51  ;;  %v3429_v53 = vpop.f32.mrb[54].mxu0  ;;  %2262 = vperm.xlu1 %3628, %v1947_v54  }
 0x1bb   :  { %v1480_v33 = vmax.f32 %v1260_v20, 0.0  ;;  %v1263_v34 = vadd.f32 %v3429_v53, %v4545_v58  ;;  %v1254_v55 = vpop.f32.mrb[55].mxu0 }
 0x1bc   :  { %v1478_v21 = vmax.f32 %v1252_v52, 0.0  ;;  %v1255_v22 = vadd.f32 %v4545_v58, %v1254_v55  ;;  %v2920_v52 = vld [vmem:[%s5370_s3 + $0x8] sm:$0xff] }
 0x1bd   :  { %v1671_v11 = vsel %vm784_vm1, %v1480_v33, -inf  ;;  %v1481_v36 = vmax.f32 %v1263_v34, 0.0  ;;  %2329 = vperm.xlu0 %3627, %v1956_v24  }
 0x1be   :  { %v4741_v0 = vmax.f32 %v1670_v14, %v1671_v11  ;;  %v1625_v37 = vsel %vm784_vm1, %v1478_v21, -inf  ;;  %v1479_v2 = vmax.f32 %v1255_v22, 0.0  ;;  %2323 = vperm.xlu1 %3628, %v1948_v61  }
 0x1bf   :  { %v4747_v62 = vmax.f32 %v1624_v25, %v1625_v37  ;;  %v1694_v23 = vsel %vm784_vm1, %v1481_v36, -inf  ;;  %v1949_v25 = vld [vmem:[%s5369_s2 + $0x30] sm:$0xff] }
 0x1c0   :  { %v4750_v48 = vmax.f32 %v1693_v35, %v1694_v23  ;;  %v1648_v12 = vsel %vm784_vm1, %v1479_v2, -inf  ;;  %v3432_v13 = vpop.f32.mrb[56].mxu0  ;;  %v1957_v7 = vsub.f32 1.0, %v1949_v25  ;;  %v2921_v37 = vld [vmem:[%s5370_s3 + $0x10] sm:$0xff] }
 0x1c1   :  { %v4753_v46 = vmax.f32 %v1647_v60, %v1648_v12  ;;  %v1276_v14 = vadd.f32 %v3432_v13, %v4545_v58  ;;  %v1267_v15 = vpop.f32.mrb[57].mxu0 }
 0x1c2   :  { %v1268_v16 = vadd.f32 %v4545_v58, %v1267_v15  ;;  %v3433_v39 = vpop.f32.mrb[58].mxu0  ;;  %2390 = vperm.xlu0 %3627, %v1957_v7   ;;  %2384 = vperm.xlu1 %3628, %v1949_v25   ;;  %v2923_v15 = vld [vmem:[%s5370_s3 + $0x20] sm:$0xff] }
 0x1c3   :  { %v1484_v1 = vmax.f32 %v1276_v14, 0.0  ;;  %v1279_v26 = vadd.f32 %v3433_v39, %v4545_v58  ;;  %v1270_v35 = vpop.f32.mrb[59].mxu0 }
 0x1c4   :  { %v1482_v6 = vmax.f32 %v1268_v16, 0.0  ;;  %v1271_v38 = vadd.f32 %v4545_v58, %v1270_v35 }
 0x1c5   :  { %v1581_v60 = vsel %vm784_vm1, %v1484_v1, -inf  ;;  %v1485_v3 = vmax.f32 %v1279_v26, 0.0 }
 0x1c6   :  { %v1582_v40 = vmax.f32 %v4719_v30, %v1581_v60  ;;  %v1535_v27 = vsel %vm784_vm1, %v1482_v6, -inf  ;;  %v1483_v59 = vmax.f32 %v1271_v38, 0.0  ;;  %2451 = vperm.xlu0 %3627, %v1958_v49   ;;  %2445 = vperm.xlu1 %3628, %v1950_v28  }
 0x1c7   :  { %v1536_v41 = vmax.f32 %v4725_v9, %v1535_v27  ;;  %v1604_v42 = vsel %vm784_vm1, %v1485_v3, -inf }
 0x1c8   :  { %v1605_v4 = vmax.f32 %v4728_v50, %v1604_v42  ;;  %v1558_v43 = vsel %vm784_vm1, %v1483_v59, -inf  ;;  %v3436_v44 = vpop.f32.mrb[60].mxu0  ;;  %v2919_v50 = vld [vmem:[%s5370_s3] sm:$0xff] }
 0x1c9   :  { %v1559_v17 = vmax.f32 %v4731_v19, %v1558_v43  ;;  %v1292_v18 = vadd.f32 %v3436_v44, %v4545_v58  ;;  %v1283_v29 = vpop.f32.mrb[61].mxu0 }
 0x1ca   :  { %v1284_v30 = vadd.f32 %v4545_v58, %v1283_v29  ;;  %v3437_v45 = vpop.f32.mrb[62].mxu0  ;;  %2928 = vperm.xlu0 %3627, %v2919_v50   ;;  %2931 = vperm.xlu1 %3628, %v2920_v52  }
 0x1cb   :  { %v1488_v57 = vmax.f32 %v1292_v18, 0.0  ;;  %v1295_v8 = vadd.f32 %v3437_v45, %v4545_v58  ;;  %v1286_v9 = vpop.f32.mrb[63].mxu0 }
 0x1cc   :  { %v1486_v47 = vmax.f32 %v1284_v30, 0.0  ;;  %v1287_v5 = vadd.f32 %v4545_v58, %v1286_v9 }
 0x1cd   :  { %v1673_v31 = vsel %vm784_vm1, %v1488_v57, -inf  ;;  %v1489_v32 = vmax.f32 %v1295_v8, 0.0 }
 0x1ce   :  { %v1674_v19 = vmax.f32 %v4741_v0, %v1673_v31  ;;  %v1627_v20 = vsel %vm784_vm1, %v1486_v47, -inf  ;;  %v1487_v51 = vmax.f32 %v1287_v5, 0.0  ;;  %2937 = vperm.xlu0 %3627, %v2922_v10   ;;  %2934 = vperm.xlu1 %3628, %v2921_v37  }
 0x1cf   :  { %v1628_v53 = vmax.f32 %v4747_v62, %v1627_v20  ;;  %v1696_v54 = vsel %vm784_vm1, %v1489_v32, -inf }
 0x1d0   :  { %v1697_v33 = vmax.f32 %v4750_v48, %v1696_v54  ;;  %v1650_v34 = vsel %vm784_vm1, %v1487_v51, -inf  ;;  %v3440_v55 = vpop.f32.mrb[64].mxu0 }
 0x1d1   :  { %v1651_v21 = vmax.f32 %v4753_v46, %v1650_v34  ;;  %v1308_v22 = vadd.f32 %v3440_v55, %v4545_v58  ;;  %v1299_v11 = vpop.f32.mrb[65].mxu0 }
 0x1d2   :  { %v1300_v36 = vadd.f32 %v4545_v58, %v1299_v11  ;;  %v3441_v0 = vpop.f32.mrb[66].mxu0  ;;  %2940 = vperm.xlu1 %3628, %v2923_v15  }
 0x1d3   :  { %v1492_v2 = vmax.f32 %v1308_v22, 0.0  ;;  %v1311_v61 = vadd.f32 %v3441_v0, %v4545_v58  ;;  %v1302_v62 = vpop.f32.mrb[67].mxu0 }
 0x1d4   :  { %v1490_v23 = vmax.f32 %v1300_v36, 0.0  ;;  %v1303_v24 = vadd.f32 %v4545_v58, %v1302_v62 }
 0x1d5   :  { %v1583_v48 = vsel %vm784_vm1, %v1492_v2, -inf  ;;  %v1493_v12 = vmax.f32 %v1311_v61, 0.0 }
 0x1d6   :  { %v4802_v13 = vmax.f32 %v1582_v40, %v1583_v48  ;;  %v1537_v46 = vsel %vm784_vm1, %v1490_v23, -inf  ;;  %v1491_v14 = vmax.f32 %v1303_v24, 0.0 }
 0x1d7   :  { %v4808_v16 = vmax.f32 %v1536_v41, %v1537_v46  ;;  %v1606_v39 = vsel %vm784_vm1, %v1493_v12, -inf }
 0x1d8   :  { %v4811_v25 = vmax.f32 %v1605_v4, %v1606_v39  ;;  %v1560_v1 = vsel %vm784_vm1, %v1491_v14, -inf  ;;  %v3444_v26 = vpop.f32.mrb[68].mxu0 }
 0x1d9   :  { %v4814_v35 = vmax.f32 %v1559_v17, %v1560_v1  ;;  %v1324_v7 = vadd.f32 %v3444_v26, %v4545_v58  ;;  %v1315_v6 = vpop.f32.mrb[69].mxu0 }
 0x1da   :  { %v1316_v38 = vadd.f32 %v4545_v58, %v1315_v6  ;;  %v3445_v60 = vpop.f32.mrb[70].mxu0 }
 0x1db   :  { %v1496_v3 = vmax.f32 %v1324_v7, 0.0  ;;  %v1327_v40 = vadd.f32 %v3445_v60, %v4545_v58  ;;  %v1318_v27 = vpop.f32.mrb[71].mxu0 }
 0x1dc   :  { %v1494_v59 = vmax.f32 %v1316_v38, 0.0  ;;  %v1319_v28 = vadd.f32 %v4545_v58, %v1318_v27 }
 0x1dd   :  { %v1675_v41 = vsel %vm784_vm1, %v1496_v3, -inf  ;;  %v1497_v42 = vmax.f32 %v1327_v40, 0.0 }
 0x1de   :  { %v1676_v49 = vmax.f32 %v1674_v19, %v1675_v41  ;;  %v1629_v4 = vsel %vm784_vm1, %v1494_v59, -inf  ;;  %v1495_v43 = vmax.f32 %v1319_v28, 0.0 }
 0x1df   :  { %v1630_v44 = vmax.f32 %v1628_v53, %v1629_v4  ;;  %v1698_v17 = vsel %vm784_vm1, %v1497_v42, -inf }
 0x1e0   :  { %v1699_v18 = vmax.f32 %v1697_v33, %v1698_v17  ;;  %v1652_v29 = vsel %vm784_vm1, %v1495_v43, -inf  ;;  %v3448_v30 = vpop.f32.mrb[72].mxu0 }
 0x1e1   :  { %v1653_v45 = vmax.f32 %v1651_v21, %v1652_v29  ;;  %v1340_v57 = vadd.f32 %v3448_v30, %v4545_v58  ;;  %v1331_v8 = vpop.f32.mrb[73].mxu0 }
 0x1e2   :  { %v1332_v9 = vadd.f32 %v4545_v58, %v1331_v8  ;;  %v3449_v47 = vpop.f32.mrb[74].mxu0 }
 0x1e3   :  { %v1500_v5 = vmax.f32 %v1340_v57, 0.0  ;;  %v1343_v50 = vadd.f32 %v3449_v47, %v4545_v58  ;;  %v1334_v31 = vpop.f32.mrb[75].mxu0 }
 0x1e4   :  { %v1498_v32 = vmax.f32 %v1332_v9, 0.0  ;;  %v1335_v19 = vadd.f32 %v4545_v58, %v1334_v31 }
 0x1e5   :  { %v4829_v20 = vsel %vm784_vm1, %v1500_v5, -inf  ;;  %v1501_v51 = vmax.f32 %v1343_v50, 0.0 }
 0x1e6   :  { %v1586_v52 = vmax.f32 %v4802_v13, %v4829_v20  ;;  %v4834_v53 = vsel %vm784_vm1, %v1498_v32, -inf  ;;  %v1499_v54 = vmax.f32 %v1335_v19, 0.0 }
 0x1e7   :  { %v1540_v33 = vmax.f32 %v4808_v16, %v4834_v53  ;;  %v4839_v34 = vsel %vm784_vm1, %v1501_v51, -inf }
 0x1e8   :  { %v1609_v55 = vmax.f32 %v4811_v25, %v4839_v34  ;;  %v4844_v10 = vsel %vm784_vm1, %v1499_v54, -inf }
 0x1e9   :  { %v1563_v21 = vmax.f32 %v4814_v35, %v4844_v10 }
 0x1eb   :  { %v3452_v22 = vpop.f32.mrb[76].mxu0 }
 0x1ec   :  { %v1356_v11 = vadd.f32 %v3452_v22, %v4545_v58  ;;  %v1347_v36 = vpop.f32.mrb[77].mxu0 }
 0x1ed   :  { %v1348_v0 = vadd.f32 %v4545_v58, %v1347_v36  ;;  %v3453_v37 = vpop.f32.mrb[78].mxu0 }
 0x1ee   :  { %v1504_v2 = vmax.f32 %v1356_v11, 0.0  ;;  %v1359_v61 = vadd.f32 %v3453_v37, %v4545_v58  ;;  %v1350_v62 = vpop.f32.mrb[79].mxu0 }
 0x1ef   :  { %v1502_v23 = vmax.f32 %v1348_v0, 0.0  ;;  %v1351_v24 = vadd.f32 %v4545_v58, %v1350_v62 }
 0x1f0   :  { %v1677_v48 = vsel %vm784_vm1, %v1504_v2, -inf  ;;  %v1505_v12 = vmax.f32 %v1359_v61, 0.0  ;;  %v3460_v13 = vpop.f32.mrb[0].mxu1 }
 0x1f1   :  { %v1678_v46 = vmax.f32 %v1676_v49, %v1677_v48  ;;  %v1631_v14 = vsel %vm784_vm1, %v1502_v23, -inf  ;;  %v1503_v15 = vmax.f32 %v1351_v24, 0.0  ;;  %v1388_v39 = vadd.f32 %v3460_v13, %v4545_v58  ;;  %v1379_v1 = vpop.f32.mrb[1].mxu1 }
 0x1f2   :  { %v1632_v26 = vmax.f32 %v1630_v44, %v1631_v14  ;;  %v1700_v7 = vsel %vm784_vm1, %v1505_v12, -inf  ;;  %v1380_v6 = vadd.f32 %v4545_v58, %v1379_v1  ;;  %v3461_v38 = vpop.f32.mrb[2].mxu1 }
 0x1f3   :  { %v1701_v60 = vmax.f32 %v1699_v18, %v1700_v7  ;;  %v1654_v3 = vsel %vm784_vm1, %v1503_v15, -inf  ;;  %v1512_v40 = vmax.f32 %v1388_v39, 0.0  ;;  %v1391_v27 = vadd.f32 %v3461_v38, %v4545_v58  ;;  %v1382_v59 = vpop.f32.mrb[3].mxu1 }
 0x1f4   :  { %v1655_v28 = vmax.f32 %v1653_v45, %v1654_v3  ;;  %v1510_v41 = vmax.f32 %v1380_v6, 0.0  ;;  %v1383_v42 = vadd.f32 %v4545_v58, %v1382_v59 }
 0x1f5   :  { %v1679_v49 = vsel %vm784_vm1, %v1512_v40, -inf  ;;  %v1513_v4 = vmax.f32 %v1391_v27, 0.0 }
 0x1f6   :  { %v4861_v43 = vmax.f32 %v1678_v46, %v1679_v49  ;;  %v1633_v44 = vsel %vm784_vm1, %v1510_v41, -inf  ;;  %v1511_v17 = vmax.f32 %v1383_v42, 0.0  ;;  %v3770_v49 = vld [vmem:[%s5372_s5] ss:$0 sm:$0xff] }
 0x1f7   :  { %v4864_v29 = vmax.f32 %v1632_v26, %v1633_v44  ;;  %v1702_v18 = vsel %vm784_vm1, %v1513_v4, -inf  ;;  %v3691_v44 = vld [vmem:[%s5373_s6 + $0x8] sm:$0xff]  }
 0x1f8   :  { %v4867_v30 = vmax.f32 %v1701_v60, %v1702_v18  ;;  %v1656_v57 = vsel %vm784_vm1, %v1511_v17, -inf }
 0x1f9   :  { %v4870_v45 = vmax.f32 %v1655_v28, %v1656_v57 }
 0x1fb   :  { %v3456_v8 = vpop.f32.mrb[80].mxu0 }
 0x1fc   :  { %v1372_v9 = vadd.f32 %v3456_v8, %v4545_v58  ;;  %v1363_v47 = vpop.f32.mrb[81].mxu0 }
 0x1fd   :  { %v1364_v5 = vadd.f32 %v4545_v58, %v1363_v47  ;;  %v3457_v50 = vpop.f32.mrb[82].mxu0 }
 0x1fe   :  { %v1508_v31 = vmax.f32 %v1372_v9, 0.0  ;;  %v1375_v32 = vadd.f32 %v3457_v50, %v4545_v58  ;;  %v1366_v19 = vpop.f32.mrb[83].mxu0 }
 0x1ff   :  { %v1506_v20 = vmax.f32 %v1364_v5, 0.0  ;;  %v1367_v51 = vadd.f32 %v4545_v58, %v1366_v19  ;;  %v3692_v19 = vld [vmem:[%s5386_s4] sm:$0xff]  }
 0x200   :  { %v1587_v54 = vsel %vm784_vm1, %v1508_v31, -inf  ;;  %v1509_v22 = vmax.f32 %v1375_v32, 0.0  ;;  %v3464_v11 = vpop.f32.mrb[4].mxu1 }
 0x201   :  { %v1588_v36 = vmax.f32 %v1586_v52, %v1587_v54  ;;  %v1541_v0 = vsel %vm784_vm1, %v1506_v20, -inf  ;;  %v1507_v37 = vmax.f32 %v1367_v51, 0.0  ;;  %v1404_v2 = vadd.f32 %v3464_v11, %v4545_v58  ;;  %v1395_v61 = vpop.f32.mrb[5].mxu1  ;;  %v3696_v51 = vld [vmem:[%s5386_s4 + $0x18] sm:$0xff]   ;;  %v3225_v54 = vld [vmem:[%s5376_s9] ss:$0 sm:$0xff] }
 0x202   :  { %v1542_v62 = vmax.f32 %v1540_v33, %v1541_v0  ;;  %v1610_v23 = vsel %vm784_vm1, %v1509_v22, -inf  ;;  %v1396_v24 = vadd.f32 %v4545_v58, %v1395_v61  ;;  %v3465_v48 = vpop.f32.mrb[6].mxu1  ;;  %v3818_v20 = vmov 0.0  }
 0x203   :  { %v1611_v12 = vmax.f32 %v1609_v55, %v1610_v23  ;;  %v1564_v52 = vsel %vm784_vm1, %v1507_v37, -inf  ;;  %v1516_v13 = vmax.f32 %v1404_v2, 0.0  ;;  %v1407_v46 = vadd.f32 %v3465_v48, %v4545_v58  ;;  %v1398_v14 = vpop.f32.mrb[7].mxu1 }
 0x204   :  { %v1565_v16 = vmax.f32 %v1563_v21, %v1564_v52  ;;  %v1514_v53 = vmax.f32 %v1396_v24, 0.0  ;;  %v1399_v33 = vadd.f32 %v4545_v58, %v1398_v14 }
 0x205   :  { %v1589_v15 = vsel %vm784_vm1, %v1516_v13, -inf  ;;  %v1517_v39 = vmax.f32 %v1407_v46, 0.0 }
 0x206   :  { %v1590_v1 = vmax.f32 %v1588_v36, %v1589_v15  ;;  %v1543_v25 = vsel %vm784_vm1, %v1514_v53, -inf  ;;  %v1515_v34 = vmax.f32 %v1399_v33, 0.0 }
 0x207   :  { %v1544_v55 = vmax.f32 %v1542_v62, %v1543_v25  ;;  %v1612_v26 = vsel %vm784_vm1, %v1517_v39, -inf }
 0x208   :  { %v1613_v7 = vmax.f32 %v1611_v12, %v1612_v26  ;;  %v1566_v6 = vsel %vm784_vm1, %v1515_v34, -inf  ;;  %v3468_v38 = vpop.f32.mrb[8].mxu1 }
 0x209   :  { %v1567_v60 = vmax.f32 %v1565_v16, %v1566_v6  ;;  %v1420_v35 = vadd.f32 %v3468_v38, %v4545_v58  ;;  %v1411_v10 = vpop.f32.mrb[9].mxu1 }
 0x20a   :  { %v1719_v21 = vpack.c.bf16 %v1613_v7, %v1590_v1  ;;  %v1412_v3 = vadd.f32 %v4545_v58, %v1411_v10  ;;  %v3469_v40 = vpop.f32.mrb[10].mxu1 }
 0x20b   :  { %v1718_v27 = vpack.c.bf16 %v1567_v60, %v1544_v55  ;;  %v1520_v59 = vmax.f32 %v1420_v35, 0.0  ;;  %v1423_v28 = vadd.f32 %v3469_v40, %v4545_v58  ;;  %v1414_v41 = vpop.f32.mrb[11].mxu1 }
 0x20c   :  { %v1518_v42 = vmax.f32 %v1412_v3, 0.0  ;;  %v1415_v4 = vadd.f32 %v3770_v49, %v1414_v41 }
 0x20d   :  { %v1681_v17 = vsel %vm784_vm1, %v1520_v59, -inf  ;;  %v1521_v18 = vmax.f32 %v1423_v28, 0.0  ;;  %3474 = vmatprep.mubr.msk.bf16.mxu1 %vm784_vm1, %v1718_v27 }
 0x20e   :  { %v1682_v57 = vmax.f32 %v4861_v43, %v1681_v17  ;;  %v1635_v58 = vsel %vm784_vm1, %v1518_v42, -inf  ;;  %v1519_v8 = vmax.f32 %v1415_v4, 0.0  ;;  %3475 = vmatmul.mubr.msk.bf16.vlgmr.msra.gmra.mrb[12].mxu1 %vm784_vm1, %v1719_v21 }
 0x20f   :  { %v1636_v9 = vmax.f32 %v4864_v29, %v1635_v58  ;;  %v1704_v47 = vsel %vm784_vm1, %v1521_v18, -inf  ;;  %3483 = vmatpush3.bf16.msra.mxu1 %v4647_v63  ;;  %v3693_v63 = vld [vmem:[%s5386_s4 + $0x8] sm:$0xff]   ;;  %v4930_v29 = vld [vmem:[%s5375_s8] sm:$0xff]  }
 0x210   :  { %v1705_v5 = vmax.f32 %v4867_v30, %v1704_v47  ;;  %v1658_v50 = vsel %vm784_vm1, %v1519_v8, -inf  ;;  %3484 = vmatprep.subr.bf16.mxu1 %v3691_v44  ;;  %v3695_v30 = vld [vmem:[%s5386_s4 + $0x10] sm:$0xff]  }
 0x211   :  { %v1659_v31 = vmax.f32 %v4870_v45, %v1658_v50  ;;  %v4941_v45 = vld [vmem:[%s5375_s8 + $0x8] sm:$0xff]  }
 0x212   :  { %v1721_v32 = vpack.c.bf16 %v1705_v5, %v1682_v57 }
 0x213   :  { %v1720_v43 = vpack.c.bf16 %v1659_v31, %v1636_v9  ;;  %3485 = vmatpush3.bf16.msra.mxu1 %v3691_v44 }
 0x214   :  { %3494 = vmatprep.subr.bf16.mxu1 %v3818_v20 }
 0x215   :  { %3478 = vmatprep.mubr.msk.bf16.mxu1 %vm784_vm1, %v1720_v43 }
 0x216   :  { %3479 = vmatmul.mubr.msk.bf16.gmra.mrb[16].mxu1 %vm784_vm1, %v1721_v32 }
 0x217   :  { %3486 = vmatprep.mubr.msk.bf16.mxu1 %vm784_vm1, %v3692_v19 }
 0x218   :  { %v2019_v34 = vpop.permute.xlu0 %2018 }
 0x21e   :  { %3487 = vmatmul.mubr.msk.bf16.vlgmr.msra.gmra.mrb[12].mxu1 %vm784_vm1, %v3693_v63  ;;  %v2086_v27 = vpop.permute.xlu0 %2085 }
 0x21f   :  { %3495 = vmatpush3.bf16.msra.mxu1 %v4930_v29  ;;  %3490 = vmatprep.mubr.msk.bf16.mxu1 %vm784_vm1, %v3695_v30 }
 0x220   :  { %3496 = vmatprep.subr.bf16.mxu1 %v3818_v20 }
 0x223   :  { %3497 = vmatpush3.bf16.msra.mxu1 %v4941_v45 }
 0x224   :  { %3502 = vmatprep.subr.bf16.mxu1 %v3818_v20 }
 0x226   :  { %3491 = vmatmul.mubr.msk.bf16.gmra.mrb[16].mxu1 %vm784_vm1, %v3696_v51 }
 0x227   :  { %3498 = vmatprep.mubr.msk.bf16.mxu1 %vm3819_vm3, %v3818_v20 }
 0x229   :  { %v2025_v39 = vpop.permute.xlu1 %2024 }
 0x22a   :  { %v2027_v1 = vmul.f32 0.0, %v2025_v39 }
 0x22d   :  { %v2080_v40 = vpop.permute.xlu1 %2079 }
 0x22e   :  { %3499 = vmatmul.mubr.bf16.vlgmr.msra.gmra.mrb[20].mxu1 %v3817_v56 }
 0x22f   :  { %3503 = vmatpush3.bf16.msra.mxu1 %v4930_v29  ;;  %3506 = vmatprep.mubr.msk.bf16.mxu1 %vm3819_vm3, %v3818_v20  ;;  %v2147_v9 = vpop.permute.xlu0 %2146 }
 0x230   :  { %3504 = vmatprep.subr.bf16.mxu1 %v3818_v20 }
 0x231   :  { %v2141_v8 = vpop.permute.xlu1 %2140 }
 0x233   :  { %3505 = vmatpush3.bf16.msra.mxu1 %v4941_v45 }
 0x234   :  { %3510 = vmatprep.subr.bf16.mxu1 %v3818_v20 }
 0x2f1   :  { %v3488_v22 = vpop.f32.mrb[12].mxu1 }
 0x2f2   :  { %v1933_v11 = vadd.f32 %v3488_v22, %v3225_v54  ;;  %v1893_v36 = vpop.f32.mrb[13].mxu1  ;;  %v2202_v22 = vpop.permute.xlu1 %2201 }
 0x2f3   :  { %v3489_v0 = vpop.f32.mrb[14].mxu1  ;;  %v1931_v46 = vadd.f32 %v3225_v54, %v1893_v36 }
 0x2f4   :  { %v4962_v56 = vadd.f32 %v3489_v0, %v3225_v54  ;;  %v1896_v37 = vpop.f32.mrb[15].mxu1 }
 0x2f5   :  { %v1932_v2 = vadd.f32 %v3225_v54, %v1896_v37 }
 0x2f9   :  { %v3492_v61 = vpop.f32.mrb[16].mxu1 }
 0x2fa   :  { %v4964_v62 = vadd.f32 %v3492_v61, %v3225_v54  ;;  %v1909_v23 = vpop.f32.mrb[17].mxu1 }
 0x2fb   :  { %v4966_v24 = vadd.f32 %v3225_v54, %v1909_v23  ;;  %v3493_v48 = vpop.f32.mrb[18].mxu1 }
 0x2fc   :  { %v4968_v12 = vadd.f32 %v3493_v48, %v3225_v54  ;;  %v1912_v52 = vpop.f32.mrb[19].mxu1 }
 0x2fd   :  { %v4970_v13 = vadd.f32 %v3225_v54, %v1912_v52 }
 0x301   :  { %v2008_v14 = vpop.f32.mrb[20].mxu1 }
 0x302   :  { %v2014_v16 = vadd.f32 %v2008_v14, %v1931_v46  ;;  %v3500_v53 = vpop.f32.mrb[21].mxu1 }
 0x303   :  { %v2011_v33 = vpop.f32.mrb[22].mxu1 }
 0x304   :  { %3704 = vtanh.f32 %v2014_v16  ;;  %v3501_v15 = vpop.f32.mrb[23].mxu1  ;;  %v2263_v16 = vpop.permute.xlu1 %2262 }
 0x30e   :  { %v3705_v25 = vpop.eup %3704 }
 0x30f   :  { %v2021_v55 = vmul.f32 %v3705_v25, %v2019_v34 }
 0x311   :  { %v2028_v26 = vadd.f32 %v2027_v1, %v2021_v55 }
 0x313   :  { %v2029_v7 = vmul.f32 %v2028_v26, %v2019_v34  ;;  %v2031_v6 = vpack.c.bf16 %v2028_v26, %v2028_v26  ;;  %v2088_v28 = vmul.f32 %v2086_v27, %v2028_v26 }
 0x315   :  { %2030 = vst.msk [vmem:[#allocation2] sm:$0xff] %vm784_vm1, %v2029_v7  ;;  %3507 = vmatmul.mubr.msk.bf16.vlgmr.msra.gmra.mrb[24].mxu1 %vm784_vm1, %v2031_v6 }
 0x316   :  { %3511 = vmatpush3.bf16.msra.mxu1 %v4930_v29  ;;  %3514 = vmatprep.mubr.msk.bf16.mxu1 %vm3819_vm3, %v3818_v20 }
 0x317   :  { %3512 = vmatprep.subr.bf16.mxu1 %v3818_v20 }
 0x31a   :  { %3513 = vmatpush3.bf16.msra.mxu1 %v4941_v45 }
 0x31b   :  { %3518 = vmatprep.subr.bf16.mxu1 %v3818_v20 }
 0x3e8   :  { %v2069_v38 = vpop.f32.mrb[24].mxu1 }
 0x3e9   :  { %v2075_v60 = vadd.f32 %v2069_v38, %v1932_v2  ;;  %v3508_v35 = vpop.f32.mrb[25].mxu1  ;;  %v2324_v38 = vpop.permute.xlu1 %2323 }
 0x3ea   :  { %v2072_v10 = vpop.f32.mrb[26].mxu1 }
 0x3eb   :  { %3706 = vtanh.f32 %v2075_v60  ;;  %v3509_v21 = vpop.f32.mrb[27].mxu1 }
 0x3f5   :  { %v3707_v3 = vpop.eup %3706 }
 0x3f6   :  { %v2082_v59 = vmul.f32 %v3707_v3, %v2080_v40 }
 0x3f8   :  { %v2089_v41 = vadd.f32 %v2088_v28, %v2082_v59 }
 0x3fa   :  { %v2090_v42 = vmul.f32 %v2089_v41, %v2080_v40  ;;  %v2092_v49 = vpack.c.bf16 %v2089_v41, %v2089_v41  ;;  %v2149_v5 = vmul.f32 %v2147_v9, %v2089_v41 }
 0x3fc   :  { %2091 = vst.msk [vmem:[#allocation2 + $0x8] sm:$0xff] %vm784_vm1, %v2090_v42  ;;  %3515 = vmatmul.mubr.msk.bf16.vlgmr.msra.gmra.mrb[28].mxu1 %vm784_vm1, %v2092_v49  ;;  %v2385_v49 = vpop.permute.xlu1 %2384 }
 0x3fd   :  { %3519 = vmatpush3.bf16.msra.mxu1 %v4930_v29  ;;  %3522 = vmatprep.mubr.msk.bf16.mxu1 %vm3819_vm3, %v3818_v20 }
 0x3fe   :  { %3520 = vmatprep.subr.bf16.mxu1 %v3818_v20 }
 0x401   :  { %3521 = vmatpush3.bf16.msra.mxu1 %v4941_v45 }
 0x402   :  { %3526 = vmatprep.subr.bf16.mxu1 %v3818_v20 }
 0x4cf   :  { %v2130_v4 = vpop.f32.mrb[28].mxu1 }
 0x4d0   :  { %v2136_v44 = vadd.f32 %v2130_v4, %v1933_v11  ;;  %v3516_v17 = vpop.f32.mrb[29].mxu1  ;;  %v2208_v11 = vpop.permute.xlu0 %2207 }
 0x4d1   :  { %v2133_v18 = vpop.f32.mrb[30].mxu1 }
 0x4d2   :  { %3708 = vtanh.f32 %v2136_v44  ;;  %v3517_v57 = vpop.f32.mrb[31].mxu1 }
 0x4d3   :  { %v5026_v57 = vld [vmem:[#allocation2 + $0x8] sm:$0xff] }
 0x4d4   :  { %v2269_v53 = vpop.permute.xlu0 %2268 }
 0x4d8   :  { %v2330_v60 = vpop.permute.xlu0 %2329 }
 0x4dc   :  { %v3709_v58 = vpop.eup %3708  ;;  %v2391_v4 = vpop.permute.xlu0 %2390 }
 0x4dd   :  { %v2143_v47 = vmul.f32 %v3709_v58, %v2141_v8 }
 0x4df   :  { %v2150_v50 = vadd.f32 %v2149_v5, %v2143_v47 }
 0x4e1   :  { %v2151_v31 = vmul.f32 %v2150_v50, %v2141_v8  ;;  %v2153_v32 = vpack.c.bf16 %v2150_v50, %v2150_v50  ;;  %v2210_v0 = vmul.f32 %v2208_v11, %v2150_v50  ;;  %v5028_v8 = vld [vmem:[#allocation2] sm:$0xff] }
 0x4e2   :  { %v2466_v9 = vpack.c.bf16 %v5026_v57, %v5028_v8 }
 0x4e3   :  { %2152 = vst.msk [vmem:[#allocation2 + $0x10] sm:$0xff] %vm784_vm1, %v2151_v31  ;;  %3523 = vmatmul.mubr.msk.bf16.vlgmr.msra.gmra.mrb[32].mxu1 %vm784_vm1, %v2153_v32 }
 0x4e4   :  { %3527 = vmatpush3.bf16.msra.mxu1 %v4930_v29  ;;  %3530 = vmatprep.mubr.msk.bf16.mxu1 %vm3819_vm3, %v3818_v20 }
 0x4e5   :  { %3528 = vmatprep.subr.bf16.mxu1 %v3818_v20 }
 0x4e8   :  { %3529 = vmatpush3.bf16.msra.mxu1 %v4941_v45 }
 0x4e9   :  { %3534 = vmatprep.subr.bf16.mxu1 %v3818_v20 }
 0x4ea   :  { %v5042_v50 = vld [vmem:[#allocation2 + $0x10] sm:$0xff] }
 0x5b6   :  { %v2191_v43 = vpop.f32.mrb[32].mxu1 }
 0x5b7   :  { %v2197_v19 = vadd.f32 %v2191_v43, %v4962_v56  ;;  %v3524_v63 = vpop.f32.mrb[33].mxu1 }
 0x5b8   :  { %v2194_v30 = vpop.f32.mrb[34].mxu1  ;;  %v3701_v63 = vld [vmem:[%s5380_s13 + $0x8] sm:$0xff]  }
 0x5b9   :  { %3710 = vtanh.f32 %v2197_v19  ;;  %v3525_v51 = vpop.f32.mrb[35].mxu1  ;;  %v3700_v19 = vld [vmem:[%s5380_s13] sm:$0xff]  }
 0x5ba   :  { %v3702_v30 = vld [vmem:[%s5379_s12] sm:$0xff]  }
 0x5c3   :  { %v3711_v54 = vpop.eup %3710 }
 0x5c4   :  { %v2204_v36 = vmul.f32 %v3711_v54, %v2202_v22 }
 0x5c6   :  { %v2211_v37 = vadd.f32 %v2210_v0, %v2204_v36 }
 0x5c8   :  { %v2212_v2 = vmul.f32 %v2211_v37, %v2202_v22  ;;  %v2214_v61 = vpack.c.bf16 %v2211_v37, %v2211_v37  ;;  %v2271_v15 = vmul.f32 %v2269_v53, %v2211_v37 }
 0x5ca   :  { %2213 = vst.msk [vmem:[#allocation2 + $0x18] sm:$0xff] %vm784_vm1, %v2212_v2  ;;  %3531 = vmatmul.mubr.msk.bf16.vlgmr.msra.gmra.mrb[36].mxu1 %vm784_vm1, %v2214_v61 }
 0x5cb   :  { %3535 = vmatpush3.bf16.msra.mxu1 %v4930_v29  ;;  %3538 = vmatprep.mubr.msk.bf16.mxu1 %vm3819_vm3, %v3818_v20 }
 0x5cc   :  { %3536 = vmatprep.subr.bf16.mxu1 %v3818_v20 }
 0x5cf   :  { %3537 = vmatpush3.bf16.msra.mxu1 %v4941_v45 }
 0x5d0   :  { %3542 = vmatprep.subr.bf16.mxu1 %v3818_v20 }
 0x5d1   :  { %v5038_v47 = vld [vmem:[#allocation2 + $0x18] sm:$0xff] }
 0x5d2   :  { %v2467_v31 = vpack.c.bf16 %v5038_v47, %v5042_v50 }
 0x69d   :  { %v2252_v56 = vpop.f32.mrb[36].mxu1 }
 0x69e   :  { %v2258_v23 = vadd.f32 %v2252_v56, %v4966_v24  ;;  %v3532_v48 = vpop.f32.mrb[37].mxu1 }
 0x69f   :  { %v2255_v52 = vpop.f32.mrb[38].mxu1  ;;  %v2452_v48 = vpop.permute.xlu0 %2451 }
 0x6a0   :  { %3712 = vtanh.f32 %v2258_v23  ;;  %v3533_v46 = vpop.f32.mrb[39].mxu1  ;;  %v2446_v23 = vpop.permute.xlu1 %2445 }
 0x6aa   :  { %v3713_v14 = vpop.eup %3712 }
 0x6ab   :  { %v2265_v33 = vmul.f32 %v3713_v14, %v2263_v16 }
 0x6ad   :  { %v2272_v39 = vadd.f32 %v2271_v15, %v2265_v33 }
 0x6af   :  { %v2273_v1 = vmul.f32 %v2272_v39, %v2263_v16  ;;  %v2275_v25 = vpack.c.bf16 %v2272_v39, %v2272_v39  ;;  %v2332_v10 = vmul.f32 %v2330_v60, %v2272_v39 }
 0x6b1   :  { %2274 = vst.msk [vmem:[#allocation2 + $0x20] sm:$0xff] %vm784_vm1, %v2273_v1  ;;  %3539 = vmatmul.mubr.msk.bf16.vlgmr.msra.gmra.mrb[40].mxu1 %vm784_vm1, %v2275_v25 }
 0x6b2   :  { %3543 = vmatpush3.bf16.msra.mxu1 %v4930_v29  ;;  %3546 = vmatprep.mubr.msk.bf16.mxu1 %vm3819_vm3, %v3818_v20 }
 0x6b3   :  { %3544 = vmatprep.subr.bf16.mxu1 %v3818_v20 }
 0x6b6   :  { %3545 = vmatpush3.bf16.msra.mxu1 %v4941_v45 }
 0x6b7   :  { %3550 = vmatprep.subr.bf16.mxu1 %v3818_v20 }
 0x6b8   :  { %v5046_v32 = vld [vmem:[#allocation2 + $0x20] sm:$0xff] }
 0x784   :  { %v2313_v24 = vpop.f32.mrb[40].mxu1 }
 0x785   :  { %v2319_v34 = vadd.f32 %v2313_v24, %v4970_v13  ;;  %v3540_v55 = vpop.f32.mrb[41].mxu1  ;;  %v3698_v13 = vld [vmem:[%s5377_s10] sm:$0xff]   ;;  %v3703_v24 = vld [vmem:[%s5379_s12 + $0x8] sm:$0xff]  }
 0x786   :  { %v2316_v26 = vpop.f32.mrb[42].mxu1 }
 0x787   :  { %3714 = vtanh.f32 %v2319_v34  ;;  %v3541_v7 = vpop.f32.mrb[43].mxu1 }
 0x791   :  { %v3715_v6 = vpop.eup %3714 }
 0x792   :  { %v2326_v35 = vmul.f32 %v3715_v6, %v2324_v38 }
 0x794   :  { %v2333_v21 = vadd.f32 %v2332_v10, %v2326_v35 }
 0x796   :  { %v2334_v3 = vmul.f32 %v2333_v21, %v2324_v38  ;;  %v2336_v40 = vpack.c.bf16 %v2333_v21, %v2333_v21  ;;  %v2393_v17 = vmul.f32 %v2391_v4, %v2333_v21 }
 0x798   :  { %2335 = vst.msk [vmem:[#allocation2 + $0x28] sm:$0xff] %vm784_vm1, %v2334_v3  ;;  %3547 = vmatmul.mubr.msk.bf16.vlgmr.msra.gmra.mrb[44].mxu1 %vm784_vm1, %v2336_v40 }
 0x799   :  { %3551 = vmatpush3.bf16.msra.mxu1 %v4930_v29  ;;  %3554 = vmatprep.mubr.msk.bf16.mxu1 %vm3819_vm3, %v3818_v20 }
 0x79a   :  { %3552 = vmatprep.subr.bf16.mxu1 %v3818_v20 }
 0x79d   :  { %3553 = vmatpush3.bf16.msra.mxu1 %v4941_v45 }
 0x79e   :  { %3558 = vmatprep.subr.bf16.mxu1 %v3698_v13 }
 0x79f   :  { %v5040_v5 = vld [vmem:[#allocation2 + $0x28] sm:$0xff] }
 0x7a0   :  { %v2468_v43 = vpack.c.bf16 %v5040_v5, %v5046_v32 }
 0x86b   :  { %v2374_v27 = vpop.f32.mrb[44].mxu1 }
 0x86c   :  { %v2380_v59 = vadd.f32 %v2374_v27, %v4964_v62  ;;  %v3548_v28 = vpop.f32.mrb[45].mxu1  ;;  %v3699_v62 = vld [vmem:[%s5377_s10 + $0x8] sm:$0xff]  }
 0x86d   :  { %v2377_v41 = vpop.f32.mrb[46].mxu1 }
 0x86e   :  { %3716 = vtanh.f32 %v2380_v59  ;;  %v3549_v42 = vpop.f32.mrb[47].mxu1 }
 0x878   :  { %v3717_v29 = vpop.eup %3716 }
 0x879   :  { %v2387_v44 = vmul.f32 %v3717_v29, %v2385_v49 }
 0x87b   :  { %v2394_v18 = vadd.f32 %v2393_v17, %v2387_v44  ;;  %v3254_v44 = vld [vmem:[%s5381_s14] ss:$0 sm:$0xff] }
 0x87d   :  { %v2395_v45 = vmul.f32 %v2394_v18, %v2385_v49  ;;  %v2397_v58 = vpack.c.bf16 %v2394_v18, %v2394_v18  ;;  %v2454_v46 = vmul.f32 %v2452_v48, %v2394_v18 }
 0x87f   :  { %2396 = vst.msk [vmem:[#allocation2 + $0x30] sm:$0xff] %vm784_vm1, %v2395_v45  ;;  %3555 = vmatmul.mubr.msk.bf16.vlgmr.msra.gmra.mrb[48].mxu1 %vm784_vm1, %v2397_v58 }
 0x880   :  { %3559 = vmatpush3.bf16.msra.mxu1 %v3698_v13  ;;  %3562 = vmatprep.mubr.msk.bf16.mxu1 %vm784_vm1, %v2466_v9 }
 0x881   :  { %3560 = vmatprep.subr.bf16.mxu1 %v3699_v62 }
 0x884   :  { %3561 = vmatpush3.bf16.msra.mxu1 %v3699_v62 }
 0x885   :  { %3570 = vmatprep.subr.bf16.mxu1 %v3700_v19 }
 0x886   :  { %v5066_v53 = vld [vmem:[#allocation2 + $0x30] sm:$0xff] }
 0x887   :  { %3563 = vmatmul.mubr.msk.bf16.vlgmr.msra.gmra.mrb[52].mxu1 %vm784_vm1, %v2467_v31 }
 0x888   :  { %3566 = vmatprep.mubr.msk.bf16.mxu1 %vm784_vm1, %v2468_v43  ;;  %3571 = vmatpush3.bf16.msra.mxu1 %v3700_v19 }
 0x889   :  { %3572 = vmatprep.subr.bf16.mxu1 %v3701_v63 }
 0x88c   :  { %3573 = vmatpush3.bf16.msra.mxu1 %v3701_v63 }
 0x88d   :  { %3582 = vmatprep.subr.bf16.mxu1 %v3702_v30 }
 0x952   :  { %v2435_v51 = vpop.f32.mrb[48].mxu1 }
 0x953   :  { %v2441_v54 = vadd.f32 %v2435_v51, %v4968_v12  ;;  %v3556_v22 = vpop.f32.mrb[49].mxu1  ;;  %v3235_v12 = vld [vmem:[%s5378_s11] ss:$0 sm:$0xff] }
 0x954   :  { %v2438_v11 = vpop.f32.mrb[50].mxu1 }
 0x955   :  { %3718 = vtanh.f32 %v2441_v54  ;;  %v3557_v36 = vpop.f32.mrb[51].mxu1 }
 0x95a   :  { %v3564_v0 = vpop.f32.mrb[52].mxu1 }
 0x95b   :  { %v2539_v37 = vpop.f32.mrb[53].mxu1  ;;  %v2548_v34 = vadd.f32 %v3564_v0, %v3235_v12 }
 0x95c   :  { %v3565_v2 = vpop.f32.mrb[54].mxu1  ;;  %v2540_v1 = vadd.f32 %v3235_v12, %v2539_v37 }
 0x95d   :  { %v2542_v61 = vpop.f32.mrb[55].mxu1  ;;  %v2551_v25 = vadd.f32 %v3565_v2, %v3235_v12 }
 0x95e   :  { %v2543_v15 = vadd.f32 %v3235_v12, %v2542_v61 }
 0x95f   :  { %v3719_v56 = vpop.eup %3718 }
 0x960   :  { %v2448_v52 = vmul.f32 %v3719_v56, %v2446_v23  ;;  %3720 = vtanh.f32 %v2543_v15  ;;  %v2924_v15 = vld [vmem:[%s5370_s3 + $0x28] sm:$0xff] }
 0x961   :  { %3722 = vtanh.f32 %v2540_v1  ;;  %v2926_v1 = vld [vmem:[%s5370_s3 + $0x38] sm:$0xff] }
 0x962   :  { %v2455_v14 = vadd.f32 %v2454_v46, %v2448_v52  ;;  %3724 = vtanh.f32 %v2551_v25  ;;  %v5143_v46 = vpop.permute.xlu1 %2931 }
 0x963   :  { %3726 = vtanh.f32 %v2548_v34 }
 0x964   :  { %v2456_v16 = vmul.f32 %v2455_v14, %v2446_v23  ;;  %v5145_v14 = vpop.permute.xlu0 %2928 }
 0x966   :  { %2457 = vst.msk [vmem:[#allocation2 + $0x38] sm:$0xff] %vm784_vm1, %v2456_v16  ;;  %v2925_v16 = vld [vmem:[%s5370_s3 + $0x30] sm:$0xff] }
 0x96a   :  { %v5079_v55 = vpop.eup %3720 }
 0x96b   :  { %v5081_v26 = vpop.eup %3722 }
 0x96c   :  { %v2627_v7 = vpack.c.bf16 %v5079_v55, %v5081_v26  ;;  %v5087_v6 = vpop.eup %3724 }
 0x96d   :  { %v5068_v33 = vld [vmem:[#allocation2 + $0x38] sm:$0xff]  ;;  %v5089_v38 = vpop.eup %3726 }
 0x96e   :  { %v2469_v39 = vpack.c.bf16 %v5068_v33, %v5066_v53  ;;  %v2628_v60 = vpack.c.bf16 %v5087_v6, %v5089_v38 }
 0x970   :  { %3567 = vmatmul.mubr.msk.bf16.gmra.mrb[56].mxu1 %vm784_vm1, %v2469_v39 }
 0x971   :  { %3574 = vmatprep.mubr.msk.bf16.mxu1 %vm784_vm1, %v2466_v9 }
 0x978   :  { %3575 = vmatmul.mubr.msk.bf16.vlgmr.msra.gmra.mrb[60].mxu1 %vm784_vm1, %v2467_v31 }
 0x979   :  { %3578 = vmatprep.mubr.msk.bf16.mxu1 %vm784_vm1, %v2468_v43  ;;  %3583 = vmatpush3.bf16.msra.mxu1 %v3702_v30 }
 0x97a   :  { %3584 = vmatprep.subr.bf16.mxu1 %v3703_v24 }
 0x97d   :  { %3585 = vmatpush3.bf16.msra.mxu1 %v3703_v24 }
 0x980   :  { %3579 = vmatmul.mubr.msk.bf16.gmra.mrb[64].mxu1 %vm784_vm1, %v2469_v39  ;;  %v5155_v39 = vpop.permute.xlu0 %2937 }
 0x981   :  { %3586 = vmatprep.mubr.msk.bf16.mxu1 %vm784_vm1, %v2627_v7 }
 0x988   :  { %3587 = vmatmul.mubr.msk.bf16.vlgmr.msra.gmra.mrb[60].mxu1 %vm784_vm1, %v2628_v60 }
 0xa43   :  { %v3568_v35 = vpop.f32.mrb[56].mxu1 }
 0xa44   :  { %v2555_v10 = vpop.f32.mrb[57].mxu1  ;;  %v2564_v40 = vadd.f32 %v3568_v35, %v3235_v12 }
 0xa45   :  { %v2556_v21 = vadd.f32 %v3235_v12, %v2555_v10  ;;  %v3569_v3 = vpop.f32.mrb[58].mxu1 }
 0xa46   :  { %v2567_v13 = vadd.f32 %v3569_v3, %v3235_v12  ;;  %v2558_v27 = vpop.f32.mrb[59].mxu1 }
 0xa47   :  { %3728 = vtanh.f32 %v2556_v21  ;;  %v2559_v59 = vadd.f32 %v3235_v12, %v2558_v27  ;;  %v5150_v12 = vpop.permute.xlu1 %2934 }
 0xa48   :  { %3730 = vtanh.f32 %v2567_v13 }
 0xa49   :  { %3732 = vtanh.f32 %v2559_v59 }
 0xa4a   :  { %3734 = vtanh.f32 %v2564_v40 }
 0xa4b   :  { %v5160_v25 = vpop.permute.xlu1 %2940 }
 0xa51   :  { %v5094_v28 = vpop.eup %3728 }
 0xa52   :  { %v5096_v41 = vpop.eup %3730 }
 0xa53   :  { %v5098_v42 = vpop.eup %3732 }
 0xa54   :  { %v5100_v29 = vpop.eup %3734  ;;  %v2629_v49 = vpack.c.bf16 %v5098_v42, %v5094_v28 }
 0xa55   :  { %v2630_v4 = vpack.c.bf16 %v5096_v41, %v5100_v29 }
 0xa56   :  { %3590 = vmatprep.mubr.msk.bf16.mxu1 %vm784_vm1, %v2629_v49 }
 0xa57   :  { %3591 = vmatmul.mubr.msk.bf16.gmra.mrb[64].mxu1 %vm784_vm1, %v2630_v4 }
 0xa5b   :  { %v3588_v17 = vpop.f32.mrb[60].mxu1 }
 0xa5c   :  { %v5111_v18 = vadd.f32 %v3588_v17, %v3254_v44  ;;  %v2774_v45 = vpop.f32.mrb[61].mxu1 }
 0xa5d   :  { %v5113_v58 = vadd.f32 %v3254_v44, %v2774_v45  ;;  %v3589_v62 = vpop.f32.mrb[62].mxu1 }
 0xa5e   :  { %v2777_v9 = vpop.f32.mrb[63].mxu1  ;;  %v2827_v31 = vsel %vm2820_vm4, %v5111_v18, -inf  ;;  %v5117_v43 = vadd.f32 %v3589_v62, %v3254_v44 }
 0xa5f   :  { %v5119_v19 = vadd.f32 %v3254_v44, %v2777_v9  ;;  %2828 = vmax.xlane.f32.xlu0 %v2827_v31  ;;  %v2821_v63 = vsel %vm2820_vm4, %v5113_v58, -inf }
 0xa60   :  { %2822 = vmax.xlane.f32.xlu1 %v2821_v63  ;;  %v2830_v51 = vsel %vm2820_vm4, %v5117_v43, -inf }
 0xa61   :  { %v2824_v30 = vsel %vm2820_vm4, %v5119_v19, -inf }
 0xa63   :  { %2825 = vmax.xlane.f32.xlu0 %v2824_v30 }
 0xa64   :  { %2831 = vmax.xlane.f32.xlu1 %v2830_v51 }
 0xaec   :  { %v5162_v24 = vpop.xlane.xlu0 %2828 }
 0xaed   :  { %v5164_v34 = vpop.xlane.xlu1 %2822  ;;  %v2847_v40 = vsub.f32 %v5111_v18, %v5162_v24 }
 0xaee   :  { %v2845_v60 = vsub.f32 %v5113_v58, %v5164_v34 }
 0xaef   :  { %v2857_v59 = vmul.f32 1.442695, %v2847_v40 }
 0xaf0   :  { %v5166_v7 = vpop.xlane.xlu0 %2825  ;;  %v2853_v21 = vmul.f32 1.442695, %v2845_v60 }
 0xaf1   :  { %v5170_v35 = vpop.xlane.xlu1 %2831  ;;  %v2846_v10 = vsub.f32 %v5119_v19, %v5166_v7 }
 0xaf2   :  { %v2848_v3 = vsub.f32 %v5117_v43, %v5170_v35  ;;  %3736 = vpow2.f32 %v2853_v21 }
 0xaf3   :  { %v2855_v13 = vmul.f32 1.442695, %v2846_v10 }
 0xaf4   :  { %v2859_v27 = vmul.f32 1.442695, %v2848_v3 }
 0xaf5   :  { %3738 = vpow2.f32 %v2855_v13 }
 0xaf6   :  { %3740 = vpow2.f32 %v2859_v27 }
 0xaf7   :  { %3742 = vpow2.f32 %v2857_v59 }
 0xafc   :  { %v3737_v49 = vpop.eup %3736 }
 0xaff   :  { %v3739_v4 = vpop.eup %3738 }
 0xb00   :  { %v3741_v17 = vpop.eup %3740  ;;  %v2872_v45 = vsel %vm2820_vm4, %v3739_v4, 0.0 }
 0xb01   :  { %v3743_v62 = vpop.eup %3742  ;;  %v2878_v9 = vsel %vm2820_vm4, %v3741_v17, 0.0 }
 0xb02   :  { %v2875_v31 = vsel %vm2820_vm4, %v3743_v62, 0.0 }
 0xb2a   :  { %v3592_v54 = vpop.f32.mrb[64].mxu1 }
 0xb2b   :  { %v5127_v22 = vadd.f32 %v3592_v54, %v3254_v44  ;;  %v2790_v11 = vpop.f32.mrb[65].mxu1 }
 0xb2c   :  { %v3593_v36 = vpop.f32.mrb[66].mxu1  ;;  %v5129_v0 = vadd.f32 %v3254_v44, %v2790_v11 }
 0xb2d   :  { %v5131_v37 = vadd.f32 %v3593_v36, %v3254_v44  ;;  %v2793_v2 = vpop.f32.mrb[67].mxu1  ;;  %v2839_v61 = vsel %vm2820_vm4, %v5127_v22, -inf }
 0xb2e   :  { %2840 = vmax.xlane.f32.xlu0 %v2839_v61  ;;  %v5135_v56 = vadd.f32 %v3254_v44, %v2793_v2  ;;  %v2833_v48 = vsel %vm2820_vm4, %v5129_v0, -inf  ;;  %v2869_v44 = vsel %vm2820_vm4, %v3737_v49, 0.0 }
 0xb2f   :  { %v2842_v23 = vsel %vm2820_vm4, %v5131_v37, -inf }
 0xb30   :  { %2843 = vmax.xlane.f32.xlu1 %v2842_v23  ;;  %v2836_v52 = vsel %vm2820_vm4, %v5135_v56, -inf }
 0xb32   :  { %2834 = vmax.xlane.f32.xlu0 %v2833_v48 }
 0xb34   :  { %2837 = vmax.xlane.f32.xlu1 %v2836_v52 }
 0xb45   :  { %2946 = vperm.xlu1 %3628, %v2925_v16  }
 0xb48   :  { %2943 = vperm.xlu0 %3627, %v2924_v15   ;;  %v2917_v15 = vlaneseq }
 0xb4c   :  { %2949 = vperm.xlu0 %3627, %v2926_v1   ;;  %v2918_v1 = vand.u32 127, %v2917_v15  ;;  %v5272_v15 = vld [vmem:[%s5369_s2 + $0x20] sm:$0xff] }
 0xb4e   :  { %vm2951_vm5 = vcmp.eq.s32.totalorder %v2918_v1, %v5145_v14  ;;  %vm2952_vm6 = vcmp.eq.s32.totalorder %v2918_v1, %v5143_v46  ;;  %vm2953_vm7 = vcmp.eq.s32.totalorder %v2918_v1, %v5150_v12  ;;  %vm2954_vm8 = vcmp.eq.s32.totalorder %v2918_v1, %v5155_v39 }
 0xb4f   :  { %v3255_v27 = vsel %vm2951_vm5, 1.0, %v3818_v20  ;;  %v3256_v14 = vsel %vm2952_vm6, 1.0, %v3818_v20  ;;  %v3257_v17 = vsel %vm2953_vm7, 1.0, %v3818_v20  ;;  %vm2955_vm9 = vcmp.eq.s32.totalorder %v2918_v1, %v5160_v25 }
 0xb50   :  { %v2975_v4 = vmul.f32 %v3255_v27, %v5113_v58  ;;  %v2977_v58 = vmul.f32 %v3257_v17, %v5111_v18  ;;  %v3258_v62 = vsel %vm2954_vm8, 1.0, %v3818_v20  ;;  %v5286_v27 = vld [vmem:[%s5369_s2 + $0x30] sm:$0xff] }
 0xb52   :  { %v2983_v12 = vsel %vm2820_vm4, %v2975_v4, 0.0  ;;  %v2989_v25 = vsel %vm2820_vm4, %v2977_v58, 0.0 }
 0xb69   :  { %2870 = vadd.xlane.f32.xlu1 %v2869_v44  ;;  %v2976_v44 = vmul.f32 %v3256_v14, %v5119_v19  ;;  %v2978_v19 = vmul.f32 %v3258_v62, %v5117_v43 }
 0xb6b   :  { %2873 = vadd.xlane.f32.xlu0 %v2872_v45  ;;  %v2986_v39 = vsel %vm2820_vm4, %v2976_v44, 0.0 }
 0xb6d   :  { %2879 = vadd.xlane.f32.xlu1 %v2878_v9 }
 0xb6f   :  { %2876 = vadd.xlane.f32.xlu0 %v2875_v31  ;;  %v3259_v31 = vsel %vm2955_vm9, 1.0, %v3818_v20 }
 0xbbb   :  { %v5182_v63 = vpop.xlane.xlu0 %2840 }
 0xbbc   :  { %v2851_v30 = vsub.f32 %v5127_v22, %v5182_v63 }
 0xbbd   :  { %v5186_v51 = vpop.xlane.xlu1 %2843 }
 0xbbe   :  { %v2852_v11 = vsub.f32 %v5131_v37, %v5186_v51  ;;  %v2865_v2 = vmul.f32 1.442695, %v2851_v30 }
 0xbbf   :  { %v5188_v54 = vpop.xlane.xlu0 %2834 }
 0xbc0   :  { %v2849_v36 = vsub.f32 %v5129_v0, %v5188_v54  ;;  %v2867_v52 = vmul.f32 1.442695, %v2852_v11  ;;  %v2979_v11 = vmul.f32 %v3259_v31, %v5129_v0 }
 0xbc1   :  { %v5194_v61 = vpop.xlane.xlu1 %2837 }
 0xbc2   :  { %v2861_v23 = vmul.f32 1.442695, %v2849_v36  ;;  %v2850_v48 = vsub.f32 %v5135_v56, %v5194_v61 }
 0xbc4   :  { %3744 = vpow2.f32 %v2861_v23  ;;  %v2863_v16 = vmul.f32 1.442695, %v2850_v48  ;;  %v2995_v48 = vsel %vm2820_vm4, %v2979_v11, 0.0 }
 0xbc5   :  { %3746 = vpow2.f32 %v2865_v2  ;;  %v2947_v45 = vpop.permute.xlu1 %2946  ;;  %v2992_v2 = vsel %vm2820_vm4, %v2978_v19, 0.0 }
 0xbc6   :  { %3748 = vpow2.f32 %v2863_v16  ;;  %vm2957_vm11 = vcmp.eq.s32.totalorder %v2918_v1, %v2947_v45 }
 0xbc7   :  { %3750 = vpow2.f32 %v2867_v52  ;;  %v2944_v59 = vpop.permute.xlu0 %2943  ;;  %v3261_v18 = vsel %vm2957_vm11, 1.0, %v3818_v20 }
 0xbc8   :  { %vm2956_vm10 = vcmp.eq.s32.totalorder %v2918_v1, %v2944_v59  ;;  %v2981_v43 = vmul.f32 %v3261_v18, %v5127_v22  ;;  %v3056_v59 = vsel %vm3023_vm13, %v5286_v27, 0.0 }
 0xbc9   :  { %v3260_v30 = vsel %vm2956_vm10, 1.0, %v3818_v20 }
 0xbca   :  { %v2980_v36 = vmul.f32 %v3260_v30, %v5135_v56  ;;  %v3001_v0 = vsel %vm2820_vm4, %v2981_v43, 0.0 }
 0xbcb   :  { %v2950_v9 = vpop.permute.xlu0 %2949 }
 0xbcc   :  { %vm2958_vm12 = vcmp.eq.s32.totalorder %v2918_v1, %v2950_v9  ;;  %v2998_v16 = vsel %vm2820_vm4, %v2980_v36, 0.0  ;;  %v3052_v1 = vsel %vm3023_vm13, %v5272_v15, 0.0 }
 0xbcd   :  { %v3262_v23 = vsel %vm2958_vm12, 1.0, %v3818_v20  ;;  %v3771_v20 = vld [vmem:[%s5369_s2] sm:$0xff] }
 0xbce   :  { %v3745_v60 = vpop.eup %3744  ;;  %v2982_v52 = vmul.f32 %v3262_v23, %v5131_v37 }
 0xbcf   :  { %v3747_v10 = vpop.eup %3746  ;;  %v2881_v21 = vsel %vm2820_vm4, %v3745_v60, 0.0 }
 0xbd0   :  { %v3749_v3 = vpop.eup %3748  ;;  %2882 = vadd.xlane.f32.xlu0 %v2881_v21  ;;  %v2887_v49 = vsel %vm2820_vm4, %v3747_v10, 0.0  ;;  %v3004_v56 = vsel %vm2820_vm4, %v2982_v52, 0.0  ;;  %v5279_v21 = vld [vmem:[%s5369_s2 + $0x28] sm:$0xff] }
 0xbd1   :  { %v2884_v40 = vsel %vm2820_vm4, %v3749_v3, 0.0  ;;  %v3751_v13 = vpop.eup %3750  ;;  %v3054_v3 = vsel %vm3023_vm13, %v5279_v21, 0.0 }
 0xbd2   :  { %2885 = vadd.xlane.f32.xlu1 %v2884_v40  ;;  %v2890_v46 = vsel %vm2820_vm4, %v3751_v13, 0.0 }
 0xbd4   :  { %2888 = vadd.xlane.f32.xlu0 %v2887_v49 }
 0xbd6   :  { %2891 = vadd.xlane.f32.xlu1 %v2890_v46  ;;  %v5293_v46 = vld [vmem:[%s5369_s2 + $0x38] sm:$0xff] }
 0xbd7   :  { %v3058_v44 = vsel %vm3023_vm13, %v5293_v46, 0.0 }
 0xbd8   :  { %2984 = vadd.xlane.f32.xlu0 %v2983_v12 }
 0xbda   :  { %2987 = vadd.xlane.f32.xlu1 %v2986_v39 }
 0xbdc   :  { %2990 = vadd.xlane.f32.xlu0 %v2989_v25 }
 0xbde   :  { %2993 = vadd.xlane.f32.xlu1 %v2992_v2 }
 0xbe0   :  { %2996 = vadd.xlane.f32.xlu0 %v2995_v48 }
 0xbe2   :  { %2999 = vadd.xlane.f32.xlu1 %v2998_v16 }
 0xbe4   :  { %3002 = vadd.xlane.f32.xlu0 %v3001_v0 }
 0xbe6   :  { %3005 = vadd.xlane.f32.xlu1 %v3004_v56 }
 0xbf6   :  { %v2871_v40 = vpop.xlane.xlu1 %2870 }
 0xbf7   :  { %2588 = vrot.lane.b32.xlu1 %v5026_v57, %s3815_s25  ;;  %v3045_v57 = vsel %vm3023_vm13, %v3771_v20, 0.0  ;;  %3752 = vlog2.f32 %v2871_v40 }
 0xbf8   :  { %v2874_v10 = vpop.xlane.xlu0 %2873 }
 0xbf9   :  { %3754 = vlog2.f32 %v2874_v10 }
 0xbfa   :  { %2586 = vrot.lane.b32.xlu0 %v5028_v8, %s3815_s25  ;;  %v3772_v8 = vld [vmem:[%s5369_s2 + $0x8] sm:$0xff]  ;;  %v2880_v14 = vpop.xlane.xlu1 %2879 }
 0xbfb   :  { %2590 = vrot.lane.b32.xlu1 %v5042_v50, %s3815_s25  ;;  %v5258_v50 = vld [vmem:[%s5369_s2 + $0x10] sm:$0xff] }
 0xbfc   :  { %v2877_v49 = vpop.xlane.xlu0 %2876 }
 0xbfd   :  { %3756 = vlog2.f32 %v2877_v49 }
 0xbfe   :  { %2592 = vrot.lane.b32.xlu0 %v5038_v47, %s3815_s25  ;;  %v3046_v47 = vsel %vm3023_vm13, %v3772_v8, 0.0  ;;  %3758 = vlog2.f32 %v2880_v14 }
 0xbff   :  { %2594 = vrot.lane.b32.xlu1 %v5046_v32, %s3815_s25  ;;  %v3048_v32 = vsel %vm3023_vm13, %v5258_v50, 0.0 }
 0xc01   :  { %v3753_v45 = vpop.eup %3752 }
 0xc02   :  { %2596 = vrot.lane.b32.xlu0 %v5040_v5, %s3815_s25  ;;  %v3047_v5 = vadd.f32 %v3046_v47, %v3045_v57  ;;  %v2894_v39 = vmul.f32 0.6931472, %v3753_v45 }
 0xc03   :  { %2598 = vrot.lane.b32.xlu1 %v5066_v53, %s3815_s25  ;;  %v3755_v62 = vpop.eup %3754 }
 0xc04   :  { %v3049_v53 = vadd.f32 %v3048_v32, %v3047_v5  ;;  %v2896_v25 = vmul.f32 0.6931472, %v3755_v62  ;;  %v2909_v2 = vadd.f32 %v2894_v39, %v5164_v34 }
 0xc06   :  { %2600 = vrot.lane.b32.xlu0 %v5068_v33, %s3815_s25  ;;  %v5265_v33 = vld [vmem:[%s5369_s2 + $0x18] sm:$0xff]  ;;  %v2910_v16 = vadd.f32 %v2896_v25, %v5166_v7  ;;  %s3820_s2 = smov [#allocation6]  }
 0xc07   :  { %v3050_v22 = vsel %vm3023_vm13, %v5265_v33, 0.0  ;;  %v3757_v19 = vpop.eup %3756  ;;  %s3085_s13 = sshll.u32 %s3820_s2, 4  ;;  %s3086_s13 = int_to_ptr.vmem [resolvable:$true] %s3085_s13 }
 0xc08   :  { %v3051_v37 = vadd.f32 %v3050_v22, %v3049_v53  ;;  %v3759_v11 = vpop.eup %3758  ;;  %v2898_v36 = vmul.f32 0.6931472, %v3757_v19  ;;  %s3779_s18 = scalar_lea.vmem %s3086_s13, 1024  ;;  %p3784_p1 = scmp.lt.s32.totalorder %s3086_s13, %s3086_s13 }
 0xc09   :  { %v2900_v48 = vmul.f32 0.6931472, %v3759_v11  ;;  %p3780_p0 = scmp.ne.s32.totalorder %s3086_s13, %s3779_s18  ;;  %p3785_p2 = scmp.lt.s32.totalorder %s3779_s18, %s3779_s18 }
 0xc0a   :  { %v3053_v60 = vadd.f32 %v3052_v1, %v3051_v37  ;;  %v2911_v5 = vadd.f32 %v2898_v36, %v5162_v24 }
 0xc0b   :  { %v2912_v34 = vadd.f32 %v2900_v48, %v5170_v35  ;;  %p3786_p3 = por %p3785_p2, %p3784_p1 }
 0xc0c   :  { %v3055_v13 = vadd.f32 %v3054_v3, %v3053_v60 }
 0xc0d   :  { %p3787_p4 = pnand %p3786_p3, %p3780_p0 }
 0xc0e   :  { %v3057_v4 = vadd.f32 %v3056_v59, %v3055_v13 }
 0xc10   :  { %v3059_v17 = vadd.f32 %v3058_v44, %v3057_v4 }
 0xc12   :  { %v3060_v58 = vrot.slane %v3059_v17, 4 }
 0xc14   :  { %v3061_v30 = vadd.f32 %v3060_v58, %v3059_v17 }
 0xc16   :  { %v3062_v43 = vrot.slane %v3061_v30, 2 }
 0xc18   :  { %v3063_v37 = vadd.f32 %v3062_v43, %v3061_v30 }
 0xc5d   :  { %v2883_v12 = vpop.xlane.xlu0 %2882 }
 0xc5e   :  { %3760 = vlog2.f32 %v2883_v12 }
 0xc5f   :  { %v2886_v9 = vpop.xlane.xlu1 %2885 }
 0xc60   :  { %3762 = vlog2.f32 %v2886_v9 }
 0xc61   :  { %v2889_v31 = vpop.xlane.xlu0 %2888 }
 0xc62   :  { %3764 = vlog2.f32 %v2889_v31 }
 0xc63   :  { %v2892_v18 = vpop.xlane.xlu1 %2891 }
 0xc64   :  { %3766 = vlog2.f32 %v2892_v18 }
 0xc65   :  { %v2985_v23 = vpop.xlane.xlu0 %2984 }
 0xc66   :  { %v3007_v52 = vsub.f32 %v2909_v2, %v2985_v23 }
 0xc67   :  { %v2988_v0 = vpop.xlane.xlu1 %2987 }
 0xc68   :  { %v3761_v56 = vpop.eup %3760  ;;  %v3015_v57 = vmul.f32 %v3771_v20, %v3007_v52  ;;  %v3008_v47 = vsub.f32 %v2910_v16, %v2988_v0 }
 0xc69   :  { %v2902_v32 = vmul.f32 0.6931472, %v3761_v56  ;;  %v2991_v53 = vpop.xlane.xlu0 %2990 }
 0xc6a   :  { %v3763_v22 = vpop.eup %3762  ;;  %v3016_v1 = vmul.f32 %v3772_v8, %v3008_v47  ;;  %v3009_v60 = vsub.f32 %v2911_v5, %v2991_v53  ;;  %v3024_v7 = vsel %vm3023_vm13, %v3015_v57, 0.0 }
 0xc6b   :  { %v2904_v10 = vmul.f32 0.6931472, %v3763_v22  ;;  %v2994_v3 = vpop.xlane.xlu1 %2993  ;;  %v2913_v40 = vadd.f32 %v2902_v32, %v5188_v54  ;;  %v3064_v54 = vrot.slane %v3063_v37, 1 }
 0xc6c   :  { %v3765_v13 = vpop.eup %3764  ;;  %v3025_v20 = vsel %vm3023_vm13, %v3016_v1, 0.0  ;;  %v3017_v59 = vmul.f32 %v5258_v50, %v3009_v60  ;;  %v3010_v24 = vsub.f32 %v2912_v34, %v2994_v3 }
 0xc6d   :  { %v2906_v49 = vmul.f32 0.6931472, %v3765_v13  ;;  %v3026_v4 = vadd.f32 %v3025_v20, %v3024_v7  ;;  %v2997_v14 = vpop.xlane.xlu0 %2996  ;;  %v2914_v8 = vadd.f32 %v2904_v10, %v5194_v61  ;;  %v3065_v18 = vadd.f32 %v3064_v54, %v3063_v37 }
 0xc6e   :  { %v3767_v44 = vpop.eup %3766  ;;  %v3027_v35 = vsel %vm3023_vm13, %v3017_v59, 0.0  ;;  %v3018_v17 = vmul.f32 %v5265_v33, %v3010_v24  ;;  %v3011_v45 = vsub.f32 %v2913_v40, %v2997_v14 }
 0xc6f   :  { %v2908_v12 = vmul.f32 0.6931472, %v3767_v44  ;;  %v3028_v58 = vadd.f32 %v3027_v35, %v3026_v4  ;;  %v3000_v62 = vpop.xlane.xlu1 %2999  ;;  %v2915_v9 = vadd.f32 %v2906_v49, %v5182_v63 }
 0xc70   :  { %v3029_v50 = vsel %vm3023_vm13, %v3018_v17, 0.0  ;;  %v3019_v39 = vmul.f32 %v5272_v15, %v3011_v45  ;;  %v3012_v19 = vsub.f32 %v2914_v8, %v3000_v62 }
 0xc71   :  { %v3030_v31 = vadd.f32 %v3029_v50, %v3028_v58  ;;  %v3003_v30 = vpop.xlane.xlu0 %3002  ;;  %v2916_v61 = vadd.f32 %v2908_v12, %v5186_v51 }
 0xc72   :  { %v3031_v25 = vsel %vm3023_vm13, %v3019_v39, 0.0  ;;  %v3020_v33 = vmul.f32 %v5279_v21, %v3012_v19  ;;  %v3013_v11 = vsub.f32 %v2915_v9, %v3003_v30  ;;  %v3066_v21 = vmax.f32 %v3065_v18, 1.0 }
 0xc73   :  { %v3032_v36 = vadd.f32 %v3031_v25, %v3030_v31  ;;  %v3006_v2 = vpop.xlane.xlu1 %3005 }
 0xc74   :  { %v3033_v23 = vsel %vm3023_vm13, %v3020_v33, 0.0  ;;  %v3021_v63 = vmul.f32 %v5286_v27, %v3013_v11  ;;  %v3014_v43 = vsub.f32 %v2916_v61, %v3006_v2  ;;  %3768 = vrcp.f32 %v3066_v21 }
 0xc75   :  { %v3034_v15 = vadd.f32 %v3033_v23, %v3032_v36  ;;  %v2587_v48 = vpop.permute.xlu0 %2586 }
 0xc76   :  { %v3035_v52 = vsel %vm3023_vm13, %v3021_v63, 0.0  ;;  %v3022_v51 = vmul.f32 %v5293_v46, %v3014_v43  ;;  %v2610_v16 = vsel %vm784_vm1, %v5081_v26, %v2587_v48 }
 0xc77   :  { %v3036_v0 = vadd.f32 %v3035_v52, %v3034_v15  ;;  %2619 = vst.msk [vmem:[#allocation6] sm:$0xff] %vm2618_vm14, %v2610_v16  ;;  %v2589_v56 = vpop.permute.xlu1 %2588 }
 0xc78   :  { %v3037_v57 = vsel %vm3023_vm13, %v3022_v51, 0.0  ;;  %v2611_v27 = vsel %vm784_vm1, %v5079_v55, %v2589_v56 }
 0xc79   :  { %v3038_v47 = vadd.f32 %v3037_v57, %v3036_v0  ;;  %2620 = vst.msk [vmem:[#allocation6 + $0x8] sm:$0xff] %vm2618_vm14, %v2611_v27  ;;  %v2593_v5 = vpop.permute.xlu0 %2592 }
 0xc7a   :  { %v2613_v46 = vsel %vm784_vm1, %v5087_v6, %v2593_v5 }
 0xc7b   :  { %v3039_v32 = vrot.slane %v3038_v47, 4  ;;  %2622 = vst.msk [vmem:[#allocation6 + $0x18] sm:$0xff] %vm2618_vm14, %v2613_v46  ;;  %v2591_v26 = vpop.permute.xlu1 %2590 }
 0xc7c   :  { %v2612_v53 = vsel %vm784_vm1, %v5089_v38, %v2591_v26 }
 0xc7d   :  { %2621 = vst.msk [vmem:[#allocation6 + $0x10] sm:$0xff] %vm2618_vm14, %v2612_v53  ;;  %v2597_v22 = vpop.permute.xlu0 %2596  ;;  %v3040_v37 = vadd.f32 %v3039_v32, %v3038_v47 }
 0xc7e   :  { %v2615_v55 = vsel %vm784_vm1, %v5098_v42, %v2597_v22  ;;  %v3769_v40 = vpop.eup %3768 }
 0xc7f   :  { %2624 = vst.msk [vmem:[#allocation6 + $0x28] sm:$0xff] %vm2618_vm14, %v2615_v55  ;;  %v2595_v1 = vpop.permute.xlu1 %2594  ;;  %v3041_v60 = vrot.slane %v3040_v37, 2 }
 0xc80   :  { %v2614_v6 = vsel %vm784_vm1, %v5094_v28, %v2595_v1 }
 0xc81   :  { %2623 = vst.msk [vmem:[#allocation6 + $0x20] sm:$0xff] %vm2618_vm14, %v2614_v6  ;;  %v2601_v34 = vpop.permute.xlu0 %2600  ;;  %v3042_v38 = vadd.f32 %v3041_v60, %v3040_v37 }
 0xc82   :  { %v2617_v10 = vsel %vm784_vm1, %v5096_v41, %v2601_v34 }
 0xc83   :  { %2626 = vst.msk [vmem:[#allocation6 + $0x38] sm:$0xff] %vm2618_vm14, %v2617_v10  ;;  %v2599_v42 = vpop.permute.xlu1 %2598  ;;  %v3043_v3 = vrot.slane %v3042_v38, 1 }
 0xc84   :  { %v2616_v13 = vsel %vm784_vm1, %v5100_v29, %v2599_v42 }
 0xc85   :  { %2625 = vst.msk [vmem:[#allocation6 + $0x30] sm:$0xff] %vm2618_vm14, %v2616_v13  ;;  %v3044_v7 = vadd.f32 %v3043_v3, %v3042_v38 }
 0xc86   :  { %3790 = shalt.err (!%p3787_p4)
}
 0xc87   :  { %s3791_s11 = scalar_lea.hbm %s5383_s16, 1024 }
 0xc88   :  { %p3792_p5 = scmp.ne.s32.totalorder %s5383_s16, %s3791_s11  ;;  %p3795_p6 = scmp.lt.u32.totalorder %s3791_s11, %s5383_s16 }
 0xc8a   :  { %p3797_p7 = pnand %p3795_p6, %p3792_p5 }
 0xc8c   :  { %3800 = shalt.err (!%p3797_p7)
}
 0xc8d   :  { %s3821_s22 = smov 128   ;;  %s3822_s23 = smov 8   ;;  %v3068_v28 = vmul.f32 %v3769_v40, %v3044_v7 }
 0xc8e   :  { %3091 = dma.vmem_to_hbm [thread:$0]  %s3086_s13, 1024, %s5383_s16, [#allocation4], %s3821_s22, %s3821_s22, %s3822_s23  }
 0xc8f   :  { %3616 = vpush %v3068_v28  ;;  %s3801_s29 = scalar_lea.hbm %s5382_s15, 16 }
 0xc90   :  { %p3802_p8 = scmp.ne.s32.totalorder %s5382_s15, %s3801_s29  ;;  %p3805_p9 = scmp.lt.u32.totalorder %s3801_s29, %s5382_s15 }
 0xc92   :  { %p3807_p10 = pnand %p3805_p9, %p3802_p8 }
 0xcc0   :  { %s3617_s26 = spop %3616 }
 0xcc1   :  { %3071 = sst [smem:[#allocation3]] %s3617_s26 }
 0xcc2   :  { %3810 = shalt.err (!%p3807_p10)
}
 0xcc3   :  { %s3823_s28 = smov [#allocation3]  }
 0xcc4   :  { %3079 = dma.smem_to_hbm %s3823_s28, 16, %s5382_s15, [#allocation5]  }
 0xcc5   :  { %3811 = dma.done.wait [#allocation5], 16  }
 0xcc6   :  { %3812 = vsyncadd [#allocation5], 4294967280 }
 0xcc7   :  { %3813 = dma.done.wait [#allocation4], 1024  }
 0xcc8   :  { %3814 = vsyncadd [#allocation4], 4294966272 }
 0xcc9   :  { %3098 = sfence }
 0xcca   :  { %3099 = vsyncpa [#allocation4], 1 }
 0xccb   :  { %3100 = vsyncpa [#allocation5], 1 }

</bundles_post_ra>
